<compile_context>
chip_gen: v7x
topology: tpu7x:2x2x1
jax: 0.10.0
libtpu: 0.0.40
codegen_flags: <defaults>
</compile_context>

<pallas_src>
import jax
import jax.numpy as jnp
from jax.experimental import pallas as pl
from jax.experimental.pallas import tpu as pltpu


def _round_up(x: int, m: int) -> int:
    return ((x + m - 1) // m) * m


def _mlp_kernel(x_ref, w1_ref, b1_ref, w2_ref, b2_ref, o_ref):
    x = x_ref[...]
    if x.dtype != jnp.bfloat16:
        # Trace-time branch: no cast op is emitted when the caller feeds bf16.
        x = x.astype(jnp.bfloat16)
    # fc1: (Bt, IN) bf16 @ (IN, Hp) bf16 -> f32 accumulation on the MXU.
    h = jnp.dot(x, w1_ref[...], preferred_element_type=jnp.float32)
    # bias + ReLU in f32 on the VPU.
    h = jnp.maximum(h + b1_ref[...], 0.0)
    # fc2: (Bt, Hp) bf16 @ (Hp, Cp) bf16 -> f32 accumulation.
    out = jnp.dot(h.astype(jnp.bfloat16), w2_ref[...],
                  preferred_element_type=jnp.float32)
    o_ref[...] = (out + b2_ref[...]).astype(o_ref.dtype)


def prepare_params(w1, b1, w2, b2):
    """One-time (outside the hot path) weight prep.

    PyTorch nn.Linear stores (out, in); we transpose to (in, out), cast the
    weights to bf16, and zero-pad hidden/classes up to multiples of 128 so
    all lane dims are 128-aligned. Zero padding keeps numerics identical on
    the un-padded output slice.
    """
    hidden, in_features = w1.shape
    num_classes = w2.shape[0]
    hp = _round_up(hidden, 128)       # 200 -> 256
    cp = _round_up(num_classes, 128)  # 2   -> 128

    w1_t = jnp.zeros((in_features, hp), jnp.bfloat16)
    w1_t = w1_t.at[:, :hidden].set(jnp.transpose(w1).astype(jnp.bfloat16))
    b1_p = jnp.zeros((1, hp), jnp.float32).at[:, :hidden].set(
        b1.astype(jnp.float32))

    w2_t = jnp.zeros((hp, cp), jnp.bfloat16)
    w2_t = w2_t.at[:hidden, :num_classes].set(
        jnp.transpose(w2).astype(jnp.bfloat16))
    b2_p = jnp.zeros((1, cp), jnp.float32).at[:, :num_classes].set(
        b2.astype(jnp.float32))

    return w1_t, b1_p, w2_t, b2_p


def _pick_batch_tile(B: int, block_b: int) -> int:
    """Batch tile: large (amortize per-step overhead), sublane-aligned, and
    capped so the batch grid has >= 2 steps for moderate B (both v7x TCs
    get work from the 'parallel' axis)."""
    if B <= 8:
        return B                      # full dim -> satisfies (8,128) rule
    half = _round_up((B + 1) // 2, 8)
    return max(8, min(block_b, half))


def cifar_lr_forward(x, w1_t, b1_p, w2_t, b2_p, num_classes, *, block_b=512):
    """x: (B, IN), ideally bf16 (cast by the upstream producer); returns (B, C) f32."""
    B, in_features = x.shape
    hp = w1_t.shape[1]
    cp = w2_t.shape[1]

    bt = _pick_batch_tile(B, block_b)
    grid = (pl.cdiv(B, bt),)          # ragged last block handled by Pallas; no jnp.pad copy

    grid_spec = pl.GridSpec(
        grid=grid,
        in_specs=[
            pl.BlockSpec((bt, in_features), lambda i: (i, 0)),   # x tile (streamed)
            pl.BlockSpec((in_features, hp), lambda i: (0, 0)),   # W1 (VMEM-resident)
            pl.BlockSpec((1, hp), lambda i: (0, 0)),             # b1 (resident)
            pl.BlockSpec((hp, cp), lambda i: (0, 0)),            # W2 (resident)
            pl.BlockSpec((1, cp), lambda i: (0, 0)),             # b2 (resident)
        ],
        out_specs=pl.BlockSpec((bt, cp), lambda i: (i, 0)),
    )

    out_padded = pl.pallas_call(
        _mlp_kernel,
        out_shape=jax.ShapeDtypeStruct((B, cp), jnp.float32),
        grid_spec=grid_spec,
        compiler_params=pltpu.CompilerParams(
            dimension_semantics=("parallel",),
            # Raise v5e's 16 MiB scoped default; still < v7x's 64 MiB physical.
            vmem_limit_bytes=48 * 1024 * 1024,
        ),
    )(x, w1_t, b1_p, w2_t, b2_p)

    return out_padded[:, :num_classes]


if __name__ == "__main__":
    input_size = 3072
    hidden = 200
    num_classes = 2
    batch = 8

    key = jax.random.PRNGKey(0)
    kx, k1, kb1, k2, kb2 = jax.random.split(key, 5)

    # Deterministic parameter init (PyTorch-style uniform(-1/sqrt(fan_in), +)).
    bound1 = 1.0 / jnp.sqrt(jnp.float32(input_size))
    bound2 = 1.0 / jnp.sqrt(jnp.float32(hidden))
    x = jax.random.normal(kx, (batch, input_size), dtype=jnp.float32)
    w1 = jax.random.uniform(k1, (hidden, input_size), jnp.float32, -bound1, bound1)
    b1 = jax.random.uniform(kb1, (hidden,), jnp.float32, -bound1, bound1)
    w2 = jax.random.uniform(k2, (num_classes, hidden), jnp.float32, -bound2, bound2)
    b2 = jax.random.uniform(kb2, (num_classes,), jnp.float32, -bound2, bound2)

    # One-time weight prep (transpose + bf16 cast + 128-padding) outside the
    # hot path; reuse these across forward calls.
    params = prepare_params(w1, b1, w2, b2)

    # Upstream producer supplies x in bf16 (done once here; in a real pipeline
    # this cast is fused into the producer, never a standalone HBM pass).
    x_bf16 = x.astype(jnp.bfloat16)

    out = cifar_lr_forward(x_bf16, *params, num_classes)
    out = jax.block_until_ready(out)
    assert out.shape == (batch, num_classes)

    # Tight check: pure-JAX reference mirroring the kernel's bf16 compute.
    xb = x.astype(jnp.bfloat16)
    w1b = w1.astype(jnp.bfloat16)
    w2b = w2.astype(jnp.bfloat16)
    h_ref = jnp.maximum(
        jnp.dot(xb, w1b.T, preferred_element_type=jnp.float32) + b1, 0.0)
    ref_bf16 = jnp.dot(h_ref.astype(jnp.bfloat16), w2b.T,
                       preferred_element_type=jnp.float32) + b2
    assert jnp.allclose(out, ref_bf16, atol=1e-4, rtol=1e-4)

    # Loose check: full-f32 forward semantics of the original module.
    ref_f32 = jnp.maximum(x @ w1.T + b1, 0.0) @ w2.T + b2
    assert jnp.allclose(out, ref_f32, atol=2e-2, rtol=2e-2)

    print("KERNEL_OK")
</pallas_src>

<mosaic_0001>
module attributes {stable_mosaic.version = 11 : i64} {
  func.func @_mlp_kernel(%arg0: i32, %arg1: memref<8x3072xbf16, #tpu.memory_space<vmem>>, %arg2: memref<3072x256xbf16, #tpu.memory_space<vmem>>, %arg3: memref<1x256xf32, #tpu.memory_space<vmem>>, %arg4: memref<256x128xbf16, #tpu.memory_space<vmem>>, %arg5: memref<1x128xf32, #tpu.memory_space<vmem>>, %arg6: memref<8x128xf32, #tpu.memory_space<vmem>>) attributes {dimension_semantics = [#tpu.dimension_semantics<parallel>], iteration_bounds = array<i64: 1>, scalar_prefetch = 0 : i64, scratch_operands = 0 : i64, tpu.core_type = #tpu.core_type<tc>, window_params = [{transform_indices = @transform_0, window_bounds = array<i64: 8, 3072>}, {pipeline_mode = #tpu.pipeline_mode<synchronous>, transform_indices = @transform_1, window_bounds = array<i64: 3072, 256>}, {pipeline_mode = #tpu.pipeline_mode<synchronous>, transform_indices = @transform_2, window_bounds = array<i64: 1, 256>}, {pipeline_mode = #tpu.pipeline_mode<synchronous>, transform_indices = @transform_3, window_bounds = array<i64: 256, 128>}, {pipeline_mode = #tpu.pipeline_mode<synchronous>, transform_indices = @transform_4, window_bounds = array<i64: 1, 128>}, {transform_indices = @transform_5, window_bounds = array<i64: 8, 128>}]} {
    %c0 = arith.constant 0 : index
    %c0_0 = arith.constant 0 : index
    %0 = vector.load %arg1[%c0, %c0_0] : memref<8x3072xbf16, #tpu.memory_space<vmem>>, vector<8x3072xbf16>
    %c0_1 = arith.constant 0 : index
    %c0_2 = arith.constant 0 : index
    %1 = vector.load %arg2[%c0_1, %c0_2] : memref<3072x256xbf16, #tpu.memory_space<vmem>>, vector<3072x256xbf16>
    %cst = arith.constant dense<0.000000e+00> : vector<8x256xf32>
    %2 = tpu.matmul %0, %1, %cst {dimension_numbers = #tpu.dot_dimension_numbers<[1], [0], [0], [1], [0, 0, 1, 1], [], []>} : vector<8x3072xbf16>, vector<3072x256xbf16>, vector<8x256xf32> -> vector<8x256xf32>
    %c0_3 = arith.constant 0 : index
    %c0_4 = arith.constant 0 : index
    %3 = vector.load %arg3[%c0_3, %c0_4] : memref<1x256xf32, #tpu.memory_space<vmem>>, vector<1x256xf32>
    %4 = vector.broadcast %3 : vector<1x256xf32> to vector<8x256xf32>
    %5 = arith.addf %2, %4 : vector<8x256xf32>
    %cst_5 = arith.constant 0.000000e+00 : f32
    %6 = vector.broadcast %cst_5 : f32 to vector<8x256xf32>
    %7 = arith.maximumf %5, %6 : vector<8x256xf32>
    %8 = arith.truncf %7 : vector<8x256xf32> to vector<8x256xbf16>
    %c0_6 = arith.constant 0 : index
    %c0_7 = arith.constant 0 : index
    %9 = vector.load %arg4[%c0_6, %c0_7] : memref<256x128xbf16, #tpu.memory_space<vmem>>, vector<256x128xbf16>
    %cst_8 = arith.constant dense<0.000000e+00> : vector<8x128xf32>
    %10 = tpu.matmul %8, %9, %cst_8 {dimension_numbers = #tpu.dot_dimension_numbers<[1], [0], [0], [1], [0, 0, 1, 1], [], []>} : vector<8x256xbf16>, vector<256x128xbf16>, vector<8x128xf32> -> vector<8x128xf32>
    %c0_9 = arith.constant 0 : index
    %c0_10 = arith.constant 0 : index
    %11 = vector.load %arg5[%c0_9, %c0_10] : memref<1x128xf32, #tpu.memory_space<vmem>>, vector<1x128xf32>
    %12 = vector.broadcast %11 : vector<1x128xf32> to vector<8x128xf32>
    %13 = arith.addf %10, %12 : vector<8x128xf32>
    %c0_11 = arith.constant 0 : index
    %c0_12 = arith.constant 0 : index
    %14 = vector.load %arg6[%c0_11, %c0_12] : memref<8x128xf32, #tpu.memory_space<vmem>>, vector<8x128xf32>
    tpu.vector_store %arg6[%c0_11, %c0_12], %13 {strides = array<i32>} : memref<8x128xf32, #tpu.memory_space<vmem>>, vector<8x128xf32>,
    return
  }
  func.func @transform_0(%arg0: i32) -> (i32, i32) {
    %c0_i32 = arith.constant 0 : i32
    %c0_i32_0 = arith.constant 0 : i32
    return %arg0, %c0_i32 : i32, i32
  }
  func.func @transform_1(%arg0: i32) -> (i32, i32) {
    %c0_i32 = arith.constant 0 : i32
    %c0_i32_0 = arith.constant 0 : i32
    %c0_i32_1 = arith.constant 0 : i32
    return %c0_i32, %c0_i32_0 : i32, i32
  }
  func.func @transform_2(%arg0: i32) -> (i32, i32) {
    %c0_i32 = arith.constant 0 : i32
    %c0_i32_0 = arith.constant 0 : i32
    %c0_i32_1 = arith.constant 0 : i32
    return %c0_i32, %c0_i32_0 : i32, i32
  }
  func.func @transform_3(%arg0: i32) -> (i32, i32) {
    %c0_i32 = arith.constant 0 : i32
    %c0_i32_0 = arith.constant 0 : i32
    %c0_i32_1 = arith.constant 0 : i32
    return %c0_i32, %c0_i32_0 : i32, i32
  }
  func.func @transform_4(%arg0: i32) -> (i32, i32) {
    %c0_i32 = arith.constant 0 : i32
    %c0_i32_0 = arith.constant 0 : i32
    %c0_i32_1 = arith.constant 0 : i32
    return %c0_i32, %c0_i32_0 : i32, i32
  }
  func.func @transform_5(%arg0: i32) -> (i32, i32) {
    %c0_i32 = arith.constant 0 : i32
    %c0_i32_0 = arith.constant 0 : i32
    return %arg0, %c0_i32 : i32, i32
  }
}

</mosaic_0001>

<bundles_post_ra>
// kernel: tpu_custom_call.1
= control target key start
LH: loop header
LB: loop body
LE: loop exit
PB: predicated region body
PF: predicated region fallthrough
CT: control target
= control target key end

     0   :  { %10 = vsyncpa [#allocation3], 0  ;;  %s4614_s0 = inlined_call_operand.hbm [shape: bf16[8,3072], index: 0, kind: input, shape index: {}]   ;;  %s4615_s1 = inlined_call_operand.hbm [shape: bf16[3072,256], index: 1, kind: input, shape index: {}]   ;;  %s4616_s2 = inlined_call_operand.hbm [shape: f32[1,256], index: 2, kind: input, shape index: {}]   ;;  %s4617_s3 = inlined_call_operand.hbm [shape: bf16[256,128], index: 3, kind: input, shape index: {}]   ;;  %s4618_s4 = inlined_call_operand.hbm [shape: f32[1,128], index: 4, kind: input, shape index: {}]   ;;  %s4619_s5 = inlined_call_operand.hbm [shape: f32[8,128], index: 5, kind: output, shape index: {}]  }
   0x1   :  { %11 = vsyncpa [#allocation6], 0 }
   0x2   :  { %12 = vsyncpa [#allocation9], 0 }
   0x3   :  { %13 = vsyncpa [#allocation4], 0  ;;  %s4442_s18 = smov [#allocation5]   ;;  %s4302_s22 = scalar_lea.hbm %s4615_s1, 49152 }
   0x4   :  { %s29_s19 = sshll.u32 %s4442_s18, 4  ;;  %p4303_p0 = scmp.ne.s32.totalorder %s4615_s1, %s4302_s22  ;;  %s30_s19 = int_to_ptr.vmem [resolvable:$true] %s29_s19 }
   0x5   :  { %p4306_p1 = scmp.lt.u32.totalorder %s4302_s22, %s4615_s1 }
   0x7   :  { %p4308_p2 = pnand %p4306_p1, %p4303_p0 }
   0x9   :  { %4311 = shalt.err (!%p4308_p2)
}
   0xa   :  { %s4312_s27 = scalar_lea.vmem %s30_s19, 49152  ;;  %p4317_p4 = scmp.lt.s32.totalorder %s30_s19, %s30_s19 }
   0xb   :  { %p4313_p3 = scmp.ne.s32.totalorder %s30_s19, %s4312_s27  ;;  %p4318_p5 = scmp.lt.s32.totalorder %s4312_s27, %s4312_s27 }
   0xd   :  { %p4319_p6 = por %p4318_p5, %p4317_p4 }
   0xf   :  { %p4320_p7 = pnand %p4319_p6, %p4313_p3 }
  0x11   :  { %4323 = shalt.err (!%p4320_p7)
}
  0x12   :  { %s4443_s28 = smov 128   ;;  %s4444_s29 = smov 8  }
  0x13   :  { %35 = dma.hbm_to_vmem [thread:$0]  %s4615_s1, 49152, %s30_s19, [#allocation6], %s4443_s28, %s4443_s28, %s4444_s29  }
  0x14   :  { %s4445_s7 = smov [#allocation8]   ;;  %s4324_s11 = scalar_lea.hbm %s4617_s3, 2048 }
  0x15   :  { %s51_s8 = sshll.u32 %s4445_s7, 4  ;;  %p4325_p8 = scmp.ne.s32.totalorder %s4617_s3, %s4324_s11  ;;  %s52_s8 = int_to_ptr.vmem [resolvable:$true] %s51_s8 }
  0x16   :  { %p4328_p9 = scmp.lt.u32.totalorder %s4324_s11, %s4617_s3 }
  0x18   :  { %p4330_p10 = pnand %p4328_p9, %p4325_p8 }
  0x1a   :  { %4333 = shalt.err (!%p4330_p10)
}
  0x1b   :  { %s4334_s16 = scalar_lea.vmem %s52_s8, 2048  ;;  %p4339_p12 = scmp.lt.s32.totalorder %s52_s8, %s52_s8 }
  0x1c   :  { %p4335_p11 = scmp.ne.s32.totalorder %s52_s8, %s4334_s16  ;;  %p4340_p13 = scmp.lt.s32.totalorder %s4334_s16, %s4334_s16 }
  0x1e   :  { %p4341_p0 = por %p4340_p13, %p4339_p12 }
  0x20   :  { %p4342_p1 = pnand %p4341_p0, %p4335_p11 }
  0x22   :  { %4345 = shalt.err (!%p4342_p1)
}
  0x23   :  { %s4446_s1 = smov 64   ;;  %s4447_s17 = smov 4  }
  0x24   :  { %57 = dma.hbm_to_vmem [thread:$0]  %s4617_s3, 2048, %s52_s8, [#allocation9], %s4446_s1, %s4446_s1, %s4447_s17  }
  0x25   :  { %s4448_s20 = smov [#allocation2]   ;;  %s4449_s22 = smov [#allocation7]  }
  0x26   :  { %s20_s21 = sshll.u32 %s4448_s20, 4  ;;  %s42_s23 = sshll.u32 %s4449_s22, 4  ;;  %s21_s21 = int_to_ptr.vmem [resolvable:$true] %s20_s21  ;;  %s43_s23 = int_to_ptr.vmem [resolvable:$true] %s42_s23 }
  0x27   :  { %s4346_s26 = scalar_lea.hbm %s4614_s0, 1536 }
  0x28   :  { %p4347_p2 = scmp.ne.s32.totalorder %s4614_s0, %s4346_s26  ;;  %p4350_p3 = scmp.lt.u32.totalorder %s4346_s26, %s4614_s0 }
  0x2a   :  { %p4352_p4 = pnand %p4350_p3, %p4347_p2 }
  0x2c   :  { %4355 = shalt.err (!%p4352_p4)
}
  0x2d   :  { %s4356_s3 = scalar_lea.vmem %s21_s21, 1536  ;;  %p4361_p6 = scmp.lt.s32.totalorder %s21_s21, %s21_s21 }
  0x2e   :  { %p4357_p5 = scmp.ne.s32.totalorder %s21_s21, %s4356_s3  ;;  %p4362_p7 = scmp.lt.s32.totalorder %s4356_s3, %s4356_s3 }
  0x30   :  { %p4363_p8 = por %p4362_p7, %p4361_p6 }
  0x32   :  { %p4364_p9 = pnand %p4363_p8, %p4357_p5 }
  0x34   :  { %4367 = shalt.err (!%p4364_p9)
}
  0x35   :  { %23 = dma.hbm_to_vmem [thread:$0]  %s4614_s0, 1536, %s21_s21, [#allocation3]  }
  0x36   :  { %s4368_s10 = scalar_lea.hbm %s4616_s2, 32 }
  0x37   :  { %p4369_p10 = scmp.ne.s32.totalorder %s4616_s2, %s4368_s10  ;;  %p4372_p11 = scmp.lt.u32.totalorder %s4368_s10, %s4616_s2 }
  0x39   :  { %p4374_p12 = pnand %p4372_p11, %p4369_p10 }
  0x3b   :  { %4377 = shalt.err (!%p4374_p12)
}
  0x3c   :  { %s4378_s15 = scalar_lea.vmem %s43_s23, 32  ;;  %p4383_p0 = scmp.lt.s32.totalorder %s43_s23, %s43_s23 }
  0x3d   :  { %p4379_p13 = scmp.ne.s32.totalorder %s43_s23, %s4378_s15  ;;  %p4384_p1 = scmp.lt.s32.totalorder %s4378_s15, %s4378_s15 }
  0x3f   :  { %p4385_p2 = por %p4384_p1, %p4383_p0 }
  0x41   :  { %p4386_p3 = pnand %p4385_p2, %p4379_p13 }
  0x43   :  { %4389 = shalt.err (!%p4386_p3)
}
  0x44   :  { %45 = dma.hbm_to_vmem [thread:$0]  %s4616_s2, 32, %s43_s23, [#allocation6]  }
  0x45   :  { %s4450_s1 = smov [#allocation10]   ;;  %s4390_s20 = scalar_lea.hbm %s4618_s4, 16 }
  0x46   :  { %s64_s17 = sshll.u32 %s4450_s1, 4  ;;  %p4391_p4 = scmp.ne.s32.totalorder %s4618_s4, %s4390_s20  ;;  %s65_s17 = int_to_ptr.vmem [resolvable:$true] %s64_s17 }
  0x47   :  { %p4394_p5 = scmp.lt.u32.totalorder %s4390_s20, %s4618_s4 }
  0x49   :  { %p4396_p6 = pnand %p4394_p5, %p4391_p4 }
  0x4b   :  { %4399 = shalt.err (!%p4396_p6)
}
  0x4c   :  { %s4400_s26 = scalar_lea.vmem %s65_s17, 16  ;;  %s4404_s2 = scalar_lea.vmem %s65_s17, 32 }
  0x4d   :  { %p4401_p7 = scmp.ne.s32.totalorder %s65_s17, %s4400_s26  ;;  %p4405_p8 = scmp.lt.s32.totalorder %s65_s17, %s65_s17 }
  0x4e   :  { %p4406_p9 = scmp.lt.s32.totalorder %s4404_s2, %s4400_s26 }
  0x50   :  { %p4407_p10 = por %p4406_p9, %p4405_p8 }
  0x52   :  { %p4408_p11 = pnand %p4407_p10, %p4401_p7 }
  0x54   :  { %4411 = shalt.err (!%p4408_p11)
}
  0x55   :  { %67 = dma.hbm_to_vmem [thread:$0]  %s4618_s4, 16, %s65_s17, [#allocation9]  }
  0x56   :  { %4434 = dma.done.wait [#allocation3], 1536  }
  0x57   :  { %4435 = vsyncadd [#allocation3], 4294965760 }
  0x58   :  { %4436 = dma.done.wait [#allocation6], 49184  }
  0x59   :  { %4437 = vsyncadd [#allocation6], 4294918112 }
  0x5a   :  { %4438 = dma.done.wait [#allocation9], 2064  }
  0x5b   :  { %4439 = vsyncadd [#allocation9], 4294965232  ;;  %v3686_v0 = vld [vmem:[#allocation5 + $0x4] ss:$8 sps:$4 sm:$0xff]   ;;  %v3690_v2 = vld [vmem:[#allocation5] ss:$8 sps:$4 sm:$0xff]  }
  0x5c   :  { %v3688_v1 = vld [vmem:[#allocation5 + $0x604] ss:$8 sps:$4 sm:$0xff]   ;;  %2496 = vmatprep.subr.bf16.mxu1 %v3686_v0  ;;  %v3691_v3 = vld [vmem:[#allocation5 + $0x600] ss:$8 sps:$4 sm:$0xff]   ;;  %v3692_v4 = vld [vmem:[#allocation5 + $0x14] ss:$8 sps:$4 sm:$0xff]  }
  0x5d   :  { %2742 = vmatprep.subr.bf16.mxu0 %v3688_v1  ;;  %2497 = vmatpush1.bf16.msra.mxu1 %v3690_v2  ;;  %v3694_v5 = vld [vmem:[#allocation5 + $0x614] ss:$8 sps:$4 sm:$0xff]   ;;  %v3696_v6 = vld [vmem:[#allocation5 + $0x10] ss:$8 sps:$4 sm:$0xff]   ;;  %v3698_v8 = vld [vmem:[#allocation5 + $0x24] ss:$8 sps:$4 sm:$0xff]  }
  0x5e   :  { %2743 = vmatpush1.bf16.msra.mxu0 %v3691_v3  ;;  %2498 = vmatprep.subr.bf16.mxu1 %v3692_v4  ;;  %v3697_v7 = vld [vmem:[#allocation5 + $0x610] ss:$8 sps:$4 sm:$0xff]   ;;  %v3700_v9 = vld [vmem:[#allocation5 + $0x624] ss:$8 sps:$4 sm:$0xff]   ;;  %v3702_v10 = vld [vmem:[#allocation5 + $0x20] ss:$8 sps:$4 sm:$0xff]  }
  0x5f   :  { %2744 = vmatprep.subr.bf16.mxu0 %v3694_v5  ;;  %v3703_v11 = vld [vmem:[#allocation5 + $0x620] ss:$8 sps:$4 sm:$0xff]   ;;  %v3704_v12 = vld [vmem:[#allocation5 + $0x34] ss:$8 sps:$4 sm:$0xff]   ;;  %v3708_v14 = vld [vmem:[#allocation5 + $0x30] ss:$8 sps:$4 sm:$0xff]  }
  0x60   :  { %v3706_v13 = vld [vmem:[#allocation5 + $0x634] ss:$8 sps:$4 sm:$0xff]   ;;  %v3709_v15 = vld [vmem:[#allocation5 + $0x630] ss:$8 sps:$4 sm:$0xff]   ;;  %v3710_v16 = vld [vmem:[#allocation5 + $0x44] ss:$8 sps:$4 sm:$0xff]  }
  0x61   :  { %2499 = vmatpush1.bf16.msra.mxu1 %v3696_v6  ;;  %v3712_v17 = vld [vmem:[#allocation5 + $0x644] ss:$8 sps:$4 sm:$0xff]   ;;  %v3714_v18 = vld [vmem:[#allocation5 + $0x40] ss:$8 sps:$4 sm:$0xff]   ;;  %v3716_v20 = vld [vmem:[#allocation5 + $0x54] ss:$8 sps:$4 sm:$0xff]  }
  0x62   :  { %2745 = vmatpush1.bf16.msra.mxu0 %v3697_v7  ;;  %2500 = vmatprep.subr.bf16.mxu1 %v3698_v8  ;;  %v3715_v19 = vld [vmem:[#allocation5 + $0x640] ss:$8 sps:$4 sm:$0xff]   ;;  %v3718_v21 = vld [vmem:[#allocation5 + $0x654] ss:$8 sps:$4 sm:$0xff]   ;;  %v3720_v22 = vld [vmem:[#allocation5 + $0x50] ss:$8 sps:$4 sm:$0xff]  }
  0x63   :  { %2746 = vmatprep.subr.bf16.mxu0 %v3700_v9  ;;  %v3721_v23 = vld [vmem:[#allocation5 + $0x650] ss:$8 sps:$4 sm:$0xff]   ;;  %v3722_v24 = vld [vmem:[#allocation5 + $0x64] ss:$8 sps:$4 sm:$0xff]   ;;  %v3726_v26 = vld [vmem:[#allocation5 + $0x60] ss:$8 sps:$4 sm:$0xff]  }
  0x64   :  { %v3724_v25 = vld [vmem:[#allocation5 + $0x664] ss:$8 sps:$4 sm:$0xff]   ;;  %v3727_v27 = vld [vmem:[#allocation5 + $0x660] ss:$8 sps:$4 sm:$0xff]   ;;  %v3728_v28 = vld [vmem:[#allocation5 + $0x74] ss:$8 sps:$4 sm:$0xff]  }
  0x65   :  { %2501 = vmatpush1.bf16.msra.mxu1 %v3702_v10  ;;  %v3730_v29 = vld [vmem:[#allocation5 + $0x674] ss:$8 sps:$4 sm:$0xff]   ;;  %v3732_v30 = vld [vmem:[#allocation5 + $0x70] ss:$8 sps:$4 sm:$0xff]   ;;  %v3734_v32 = vld [vmem:[#allocation5 + $0x84] ss:$8 sps:$4 sm:$0xff]  }
  0x66   :  { %2747 = vmatpush1.bf16.msra.mxu0 %v3703_v11  ;;  %2502 = vmatprep.subr.bf16.mxu1 %v3704_v12  ;;  %v3733_v31 = vld [vmem:[#allocation5 + $0x670] ss:$8 sps:$4 sm:$0xff]   ;;  %v3736_v33 = vld [vmem:[#allocation5 + $0x684] ss:$8 sps:$4 sm:$0xff]   ;;  %v3738_v34 = vld [vmem:[#allocation5 + $0x80] ss:$8 sps:$4 sm:$0xff]  }
  0x67   :  { %2748 = vmatprep.subr.bf16.mxu0 %v3706_v13  ;;  %v3739_v35 = vld [vmem:[#allocation5 + $0x680] ss:$8 sps:$4 sm:$0xff]   ;;  %v3740_v36 = vld [vmem:[#allocation5 + $0x94] ss:$8 sps:$4 sm:$0xff]   ;;  %v3744_v38 = vld [vmem:[#allocation5 + $0x90] ss:$8 sps:$4 sm:$0xff]  }
  0x68   :  { %v3742_v37 = vld [vmem:[#allocation5 + $0x694] ss:$8 sps:$4 sm:$0xff]   ;;  %v3745_v39 = vld [vmem:[#allocation5 + $0x690] ss:$8 sps:$4 sm:$0xff]   ;;  %v3746_v40 = vld [vmem:[#allocation5 + $0xa4] ss:$8 sps:$4 sm:$0xff]  }
  0x69   :  { %2503 = vmatpush1.bf16.msra.mxu1 %v3708_v14  ;;  %v3748_v41 = vld [vmem:[#allocation5 + $0x6a4] ss:$8 sps:$4 sm:$0xff]   ;;  %v3750_v42 = vld [vmem:[#allocation5 + $0xa0] ss:$8 sps:$4 sm:$0xff]   ;;  %v3752_v44 = vld [vmem:[#allocation5 + $0xb4] ss:$8 sps:$4 sm:$0xff]  }
  0x6a   :  { %2749 = vmatpush1.bf16.msra.mxu0 %v3709_v15  ;;  %2504 = vmatprep.subr.bf16.mxu1 %v3710_v16  ;;  %v3751_v43 = vld [vmem:[#allocation5 + $0x6a0] ss:$8 sps:$4 sm:$0xff]   ;;  %v3754_v45 = vld [vmem:[#allocation5 + $0x6b4] ss:$8 sps:$4 sm:$0xff]   ;;  %v3756_v47 = vld [vmem:[#allocation5 + $0xb0] ss:$8 sps:$4 sm:$0xff]  }
  0x6b   :  { %2750 = vmatprep.subr.bf16.mxu0 %v3712_v17  ;;  %v84_v46 = vld [vmem:[#allocation2] sm:$0xff]  ;;  %v3757_v49 = vld [vmem:[#allocation5 + $0x6b0] ss:$8 sps:$4 sm:$0xff]   ;;  %v3764_v56 = vld [vmem:[#allocation5 + $0xd4] ss:$8 sps:$4 sm:$0xff]   ;;  %s4451_s4 = smov [#allocation11]  }
  0x6c   :  { %v3186_v48 = vcombine.high %v84_v46, %v84_v46  ;;  %v90_v50 = vld [vmem:[#allocation2 + $0x30] sm:$0xff]  ;;  %v3758_v51 = vld [vmem:[#allocation5 + $0xc4] ss:$8 sps:$4 sm:$0xff]   ;;  %v3762_v54 = vld [vmem:[#allocation5 + $0xc0] ss:$8 sps:$4 sm:$0xff]   ;;  %v3185_v6 = vcombine.low %v84_v46, %v84_v46  ;;  %s3174_s28 = sshll.u32 %s4451_s4, 4  ;;  %s3175_s28 = int_to_ptr.vmem [resolvable:$true] %s3174_s28 }
  0x6d   :  { %2505 = vmatpush1.bf16.msra.mxu1 %v3714_v18  ;;  %v3760_v52 = vld [vmem:[#allocation5 + $0x6c4] ss:$8 sps:$4 sm:$0xff]   ;;  %v3198_v53 = vcombine.high %v90_v50, %v90_v50  ;;  %v3763_v55 = vld [vmem:[#allocation5 + $0x6c0] ss:$8 sps:$4 sm:$0xff]   ;;  %v3766_v57 = vld [vmem:[#allocation5 + $0x6d4] ss:$8 sps:$4 sm:$0xff]   ;;  %v3197_v7 = vcombine.low %v90_v50, %v90_v50  ;;  %p4417_p13 = scmp.lt.s32.totalorder %s3175_s28, %s3175_s28 }
  0x6e   :  { %2751 = vmatpush1.bf16.msra.mxu0 %v3715_v19  ;;  %2506 = vmatprep.subr.bf16.mxu1 %v3716_v20  ;;  %v3768_v58 = vld [vmem:[#allocation5 + $0xd0] ss:$8 sps:$4 sm:$0xff]   ;;  %v3770_v60 = vld [vmem:[#allocation5 + $0xe4] ss:$8 sps:$4 sm:$0xff]   ;;  %v3774_v62 = vld [vmem:[#allocation5 + $0xe0] ss:$8 sps:$4 sm:$0xff]  }
  0x6f   :  { %2752 = vmatprep.subr.bf16.mxu0 %v3718_v21  ;;  %2528 = vmatprep.mubr.bf16.mxu1 %v3186_v48  ;;  %v3769_v59 = vld [vmem:[#allocation5 + $0x6d0] ss:$8 sps:$4 sm:$0xff]   ;;  %v3772_v61 = vld [vmem:[#allocation5 + $0x6e4] ss:$8 sps:$4 sm:$0xff]   ;;  %v3775_v63 = vld [vmem:[#allocation5 + $0x6e0] ss:$8 sps:$4 sm:$0xff]  }
  0x70   :  { %2774 = vmatprep.mubr.bf16.mxu0 %v3198_v53  ;;  %v3776_v0 = vld [vmem:[#allocation5 + $0xf4] ss:$8 sps:$4 sm:$0xff]   ;;  %v3780_v2 = vld [vmem:[#allocation5 + $0xf0] ss:$8 sps:$4 sm:$0xff]   ;;  %v3786_v4 = vld [vmem:[#allocation5 + $0x104] ss:$8 sps:$4 sm:$0xff]  }
  0x71   :  { %2507 = vmatpush1.bf16.msra.mxu1 %v3720_v22  ;;  %v3778_v1 = vld [vmem:[#allocation5 + $0x6f4] ss:$8 sps:$4 sm:$0xff]   ;;  %v3781_v3 = vld [vmem:[#allocation5 + $0x6f0] ss:$8 sps:$4 sm:$0xff]   ;;  %v3791_v5 = vld [vmem:[#allocation5 + $0x704] ss:$8 sps:$4 sm:$0xff]  }
  0x72   :  { %2753 = vmatpush1.bf16.msra.mxu0 %v3721_v23  ;;  %2508 = vmatprep.subr.bf16.mxu1 %v3722_v24  ;;  %v3784_v8 = vld [vmem:[#allocation5 + $0x100] ss:$8 sps:$4 sm:$0xff]   ;;  %v3794_v10 = vld [vmem:[#allocation5 + $0x114] ss:$8 sps:$4 sm:$0xff]   ;;  %v3792_v12 = vld [vmem:[#allocation5 + $0x110] ss:$8 sps:$4 sm:$0xff]  }
  0x73   :  { %2754 = vmatprep.subr.bf16.mxu0 %v3724_v25  ;;  %v3789_v9 = vld [vmem:[#allocation5 + $0x700] ss:$8 sps:$4 sm:$0xff]   ;;  %v3797_v11 = vld [vmem:[#allocation5 + $0x714] ss:$8 sps:$4 sm:$0xff]   ;;  %v3795_v13 = vld [vmem:[#allocation5 + $0x710] ss:$8 sps:$4 sm:$0xff]  }
  0x74   :  { %v3800_v14 = vld [vmem:[#allocation5 + $0x124] ss:$8 sps:$4 sm:$0xff]   ;;  %v3798_v16 = vld [vmem:[#allocation5 + $0x120] ss:$8 sps:$4 sm:$0xff]   ;;  %v3806_v18 = vld [vmem:[#allocation5 + $0x134] ss:$8 sps:$4 sm:$0xff]  }
  0x75   :  { %2509 = vmatpush1.bf16.msra.mxu1 %v3726_v26  ;;  %v3803_v15 = vld [vmem:[#allocation5 + $0x724] ss:$8 sps:$4 sm:$0xff]   ;;  %v3801_v17 = vld [vmem:[#allocation5 + $0x720] ss:$8 sps:$4 sm:$0xff]   ;;  %v3809_v19 = vld [vmem:[#allocation5 + $0x734] ss:$8 sps:$4 sm:$0xff]  }
  0x76   :  { %2755 = vmatpush1.bf16.msra.mxu0 %v3727_v27  ;;  %2510 = vmatprep.subr.bf16.mxu1 %v3728_v28  ;;  %v3804_v20 = vld [vmem:[#allocation5 + $0x130] ss:$8 sps:$4 sm:$0xff]   ;;  %v3812_v22 = vld [vmem:[#allocation5 + $0x144] ss:$8 sps:$4 sm:$0xff]   ;;  %v3810_v24 = vld [vmem:[#allocation5 + $0x140] ss:$8 sps:$4 sm:$0xff]  }
  0x77   :  { %2756 = vmatprep.subr.bf16.mxu0 %v3730_v29  ;;  %v3807_v21 = vld [vmem:[#allocation5 + $0x730] ss:$8 sps:$4 sm:$0xff]   ;;  %v3815_v23 = vld [vmem:[#allocation5 + $0x744] ss:$8 sps:$4 sm:$0xff]   ;;  %v3813_v25 = vld [vmem:[#allocation5 + $0x740] ss:$8 sps:$4 sm:$0xff]  }
  0x78   :  { %v3818_v26 = vld [vmem:[#allocation5 + $0x154] ss:$8 sps:$4 sm:$0xff]   ;;  %v3816_v28 = vld [vmem:[#allocation5 + $0x150] ss:$8 sps:$4 sm:$0xff]   ;;  %v3848_v50 = vld [vmem:[#allocation5 + $0x1a4] ss:$8 sps:$4 sm:$0xff]  }
  0x79   :  { %2511 = vmatpush1.bf16.msra.mxu1 %v3732_v30  ;;  %v3821_v27 = vld [vmem:[#allocation5 + $0x754] ss:$8 sps:$4 sm:$0xff]   ;;  %v3819_v29 = vld [vmem:[#allocation5 + $0x750] ss:$8 sps:$4 sm:$0xff]   ;;  %v3824_v30 = vld [vmem:[#allocation5 + $0x164] ss:$8 sps:$4 sm:$0xff]  }
  0x7a   :  { %2757 = vmatpush1.bf16.msra.mxu0 %v3733_v31  ;;  %2512 = vmatprep.subr.bf16.mxu1 %v3734_v32  ;;  %v3827_v31 = vld [vmem:[#allocation5 + $0x764] ss:$8 sps:$4 sm:$0xff]   ;;  %v3842_v46 = vld [vmem:[#allocation5 + $0x194] ss:$8 sps:$4 sm:$0xff]   ;;  %v3840_v48 = vld [vmem:[#allocation5 + $0x190] ss:$8 sps:$4 sm:$0xff]  }
  0x7b   :  { %2758 = vmatprep.subr.bf16.mxu0 %v3736_v33  ;;  %v4542_v32 = vld [vmem:[#allocation2 + $0x8] sm:$0xff]  ;;  %s4412_s29 = scalar_lea.vmem %s3175_s28, 128 }
  0x7c   :  { %v3822_v33 = vld [vmem:[#allocation5 + $0x160] ss:$8 sps:$4 sm:$0xff]   ;;  %p4413_p12 = scmp.ne.s32.totalorder %s3175_s28, %s4412_s29  ;;  %p4418_p0 = scmp.lt.s32.totalorder %s4412_s29, %s4412_s29 }
  0x7d   :  { %2513 = vmatpush1.bf16.msra.mxu1 %v3738_v34  ;;  %v3825_v34 = vld [vmem:[#allocation5 + $0x760] ss:$8 sps:$4 sm:$0xff]  }
  0x7e   :  { %2759 = vmatpush1.bf16.msra.mxu0 %v3739_v35  ;;  %2514 = vmatprep.subr.bf16.mxu1 %v3740_v36  ;;  %v3188_v35 = vcombine.high %v4542_v32, %v4542_v32  ;;  %v4546_v36 = vld [vmem:[#allocation2 + $0x38] sm:$0xff]  ;;  %v3849_v53 = vld [vmem:[#allocation5 + $0x7a0] ss:$8 sps:$4 sm:$0xff]   ;;  %p4419_p1 = por %p4418_p0, %p4417_p13 }
  0x7f   :  { %2760 = vmatprep.subr.bf16.mxu0 %v3742_v37  ;;  %v3830_v37 = vld [vmem:[#allocation5 + $0x174] ss:$8 sps:$4 sm:$0xff]  }
  0x80   :  { %p4420_p2 = pnand %p4419_p1, %p4413_p12 }
  0x81   :  { %2515 = vmatpush1.bf16.msra.mxu1 %v3744_v38  ;;  %v3200_v38 = vcombine.high %v4546_v36, %v4546_v36 }
  0x82   :  { %2761 = vmatpush1.bf16.msra.mxu0 %v3745_v39  ;;  %2516 = vmatprep.subr.bf16.mxu1 %v3746_v40  ;;  %v3833_v39 = vld [vmem:[#allocation5 + $0x774] ss:$8 sps:$4 sm:$0xff]   ;;  %v3828_v40 = vld [vmem:[#allocation5 + $0x170] ss:$8 sps:$4 sm:$0xff]  }
  0x83   :  { %2762 = vmatprep.subr.bf16.mxu0 %v3748_v41  ;;  %v3831_v41 = vld [vmem:[#allocation5 + $0x770] ss:$8 sps:$4 sm:$0xff]  }
  0x85   :  { %2517 = vmatpush1.bf16.msra.mxu1 %v3750_v42  ;;  %v3836_v42 = vld [vmem:[#allocation5 + $0x184] ss:$8 sps:$4 sm:$0xff]  }
  0x86   :  { %2763 = vmatpush1.bf16.msra.mxu0 %v3751_v43  ;;  %2518 = vmatprep.subr.bf16.mxu1 %v3752_v44  ;;  %v3839_v43 = vld [vmem:[#allocation5 + $0x784] ss:$8 sps:$4 sm:$0xff]   ;;  %v3834_v44 = vld [vmem:[#allocation5 + $0x180] ss:$8 sps:$4 sm:$0xff]  }
  0x87   :  { %2764 = vmatprep.subr.bf16.mxu0 %v3754_v45  ;;  %v3837_v45 = vld [vmem:[#allocation5 + $0x780] ss:$8 sps:$4 sm:$0xff]  }
  0x89   :  { %2519 = vmatpush1.bf16.msra.mxu1 %v3756_v47  ;;  %v3845_v47 = vld [vmem:[#allocation5 + $0x794] ss:$8 sps:$4 sm:$0xff]  }
  0x8a   :  { %2765 = vmatpush1.bf16.msra.mxu0 %v3757_v49  ;;  %2520 = vmatprep.subr.bf16.mxu1 %v3758_v51  ;;  %v3843_v49 = vld [vmem:[#allocation5 + $0x790] ss:$8 sps:$4 sm:$0xff]   ;;  %v3851_v51 = vld [vmem:[#allocation5 + $0x7a4] ss:$8 sps:$4 sm:$0xff]  }
  0x8b   :  { %2766 = vmatprep.subr.bf16.mxu0 %v3760_v52  ;;  %v3846_v52 = vld [vmem:[#allocation5 + $0x1a0] ss:$8 sps:$4 sm:$0xff]  }
  0x8d   :  { %2521 = vmatpush1.bf16.msra.mxu1 %v3762_v54  ;;  %v3854_v54 = vld [vmem:[#allocation5 + $0x1b4] ss:$8 sps:$4 sm:$0xff]  }
  0x8e   :  { %2767 = vmatpush1.bf16.msra.mxu0 %v3763_v55  ;;  %2522 = vmatprep.subr.bf16.mxu1 %v3764_v56  ;;  %v3857_v55 = vld [vmem:[#allocation5 + $0x7b4] ss:$8 sps:$4 sm:$0xff]   ;;  %v3852_v56 = vld [vmem:[#allocation5 + $0x1b0] ss:$8 sps:$4 sm:$0xff]  }
  0x8f   :  { %2768 = vmatprep.subr.bf16.mxu0 %v3766_v57  ;;  %v3855_v57 = vld [vmem:[#allocation5 + $0x7b0] ss:$8 sps:$4 sm:$0xff]  }
  0x91   :  { %2523 = vmatpush1.bf16.msra.mxu1 %v3768_v58  ;;  %v3860_v58 = vld [vmem:[#allocation5 + $0x1c4] ss:$8 sps:$4 sm:$0xff]  }
  0x92   :  { %2769 = vmatpush1.bf16.msra.mxu0 %v3769_v59  ;;  %2524 = vmatprep.subr.bf16.mxu1 %v3770_v60  ;;  %v3863_v59 = vld [vmem:[#allocation5 + $0x7c4] ss:$8 sps:$4 sm:$0xff]   ;;  %v3858_v60 = vld [vmem:[#allocation5 + $0x1c0] ss:$8 sps:$4 sm:$0xff]  }
  0x93   :  { %2770 = vmatprep.subr.bf16.mxu0 %v3772_v61  ;;  %v3861_v61 = vld [vmem:[#allocation5 + $0x7c0] ss:$8 sps:$4 sm:$0xff]  }
  0x95   :  { %2525 = vmatpush1.bf16.msra.mxu1 %v3774_v62  ;;  %v3866_v62 = vld [vmem:[#allocation5 + $0x1d4] ss:$8 sps:$4 sm:$0xff]  }
  0x96   :  { %2771 = vmatpush1.bf16.msra.mxu0 %v3775_v63  ;;  %2526 = vmatprep.subr.bf16.mxu1 %v3776_v0  ;;  %v3869_v63 = vld [vmem:[#allocation5 + $0x7d4] ss:$8 sps:$4 sm:$0xff]   ;;  %v3864_v0 = vld [vmem:[#allocation5 + $0x1d0] ss:$8 sps:$4 sm:$0xff]  }
  0x97   :  { %2772 = vmatprep.subr.bf16.mxu0 %v3778_v1  ;;  %v3867_v1 = vld [vmem:[#allocation5 + $0x7d0] ss:$8 sps:$4 sm:$0xff]  }
  0x99   :  { %2527 = vmatpush1.bf16.msra.mxu1 %v3780_v2  ;;  %v3872_v2 = vld [vmem:[#allocation5 + $0x1e4] ss:$8 sps:$4 sm:$0xff]  }
  0x9a   :  { %2773 = vmatpush1.bf16.msra.mxu0 %v3781_v3  ;;  %2537 = vmatprep.subr.bf16.mxu1 %v3786_v4  ;;  %v3875_v3 = vld [vmem:[#allocation5 + $0x7e4] ss:$8 sps:$4 sm:$0xff]   ;;  %v3870_v4 = vld [vmem:[#allocation5 + $0x1e0] ss:$8 sps:$4 sm:$0xff]  }
  0x9b   :  { %2783 = vmatprep.subr.bf16.mxu0 %v3791_v5  ;;  %v3873_v5 = vld [vmem:[#allocation5 + $0x7e0] ss:$8 sps:$4 sm:$0xff]  }
  0x9c   :  { %2529 = vmatmul.mubr.bf16.vlgmr.msra.gmra.mrb[0].mxu1 %v3185_v6  ;;  %v3878_v6 = vld [vmem:[#allocation5 + $0x1f4] ss:$8 sps:$4 sm:$0xff]  }
  0x9d   :  { %2775 = vmatmul.mubr.bf16.vlgmr.msra.gmra.mrb[0].mxu0 %v3197_v7  ;;  %2538 = vmatpush1.bf16.msra.mxu1 %v3784_v8  ;;  %v3881_v7 = vld [vmem:[#allocation5 + $0x7f4] ss:$8 sps:$4 sm:$0xff]   ;;  %v3876_v8 = vld [vmem:[#allocation5 + $0x1f0] ss:$8 sps:$4 sm:$0xff]  }
  0x9e   :  { %2784 = vmatpush1.bf16.msra.mxu0 %v3789_v9  ;;  %2539 = vmatprep.subr.bf16.mxu1 %v3794_v10  ;;  %v3879_v9 = vld [vmem:[#allocation5 + $0x7f0] ss:$8 sps:$4 sm:$0xff]   ;;  %v3886_v10 = vld [vmem:[#allocation5 + $0x204] ss:$8 sps:$4 sm:$0xff]  }
  0x9f   :  { %2785 = vmatprep.subr.bf16.mxu0 %v3797_v11  ;;  %2569 = vmatprep.mubr.bf16.mxu1 %v3188_v35  ;;  %v3891_v11 = vld [vmem:[#allocation5 + $0x804] ss:$8 sps:$4 sm:$0xff]   ;;  %v3913_v35 = vld [vmem:[#allocation5 + $0x840] ss:$8 sps:$4 sm:$0xff]  }
  0xa0   :  { %2815 = vmatprep.mubr.bf16.mxu0 %v3200_v38  ;;  %v3916_v38 = vld [vmem:[#allocation5 + $0x250] ss:$8 sps:$4 sm:$0xff]  }
  0xa1   :  { %2540 = vmatpush1.bf16.msra.mxu1 %v3792_v12  ;;  %v3187_v12 = vcombine.low %v4542_v32, %v4542_v32  ;;  %v3912_v32 = vld [vmem:[#allocation5 + $0x244] ss:$8 sps:$4 sm:$0xff]  }
  0xa2   :  { %2786 = vmatpush1.bf16.msra.mxu0 %v3795_v13  ;;  %2541 = vmatprep.subr.bf16.mxu1 %v3800_v14  ;;  %v3884_v13 = vld [vmem:[#allocation5 + $0x200] ss:$8 sps:$4 sm:$0xff]   ;;  %v3199_v14 = vcombine.low %v4546_v36, %v4546_v36  ;;  %v3918_v36 = vld [vmem:[#allocation5 + $0x254] ss:$8 sps:$4 sm:$0xff]  }
  0xa3   :  { %2787 = vmatprep.subr.bf16.mxu0 %v3803_v15  ;;  %v3889_v15 = vld [vmem:[#allocation5 + $0x800] ss:$8 sps:$4 sm:$0xff]  }
  0xa5   :  { %2542 = vmatpush1.bf16.msra.mxu1 %v3798_v16  ;;  %v3894_v16 = vld [vmem:[#allocation5 + $0x214] ss:$8 sps:$4 sm:$0xff]  }
  0xa6   :  { %2788 = vmatpush1.bf16.msra.mxu0 %v3801_v17  ;;  %2543 = vmatprep.subr.bf16.mxu1 %v3806_v18  ;;  %v3897_v17 = vld [vmem:[#allocation5 + $0x814] ss:$8 sps:$4 sm:$0xff]  }
  0xa7   :  { %2789 = vmatprep.subr.bf16.mxu0 %v3809_v19  ;;  %v4554_v18 = vld [vmem:[#allocation2 + $0x10] sm:$0xff] }
  0xa8   :  { %v3190_v19 = vcombine.high %v4554_v18, %v4554_v18 }
  0xa9   :  { %2544 = vmatpush1.bf16.msra.mxu1 %v3804_v20  ;;  %v4558_v20 = vld [vmem:[#allocation2 + $0x40] sm:$0xff] }
  0xaa   :  { %2790 = vmatpush1.bf16.msra.mxu0 %v3807_v21  ;;  %2545 = vmatprep.subr.bf16.mxu1 %v3812_v22  ;;  %v3892_v21 = vld [vmem:[#allocation5 + $0x210] ss:$8 sps:$4 sm:$0xff]  }
  0xab   :  { %2791 = vmatprep.subr.bf16.mxu0 %v3815_v23  ;;  %v3895_v22 = vld [vmem:[#allocation5 + $0x810] ss:$8 sps:$4 sm:$0xff]   ;;  %v3202_v23 = vcombine.high %v4558_v20, %v4558_v20 }
  0xad   :  { %2546 = vmatpush1.bf16.msra.mxu1 %v3810_v24  ;;  %v3900_v24 = vld [vmem:[#allocation5 + $0x224] ss:$8 sps:$4 sm:$0xff]  }
  0xae   :  { %2792 = vmatpush1.bf16.msra.mxu0 %v3813_v25  ;;  %2547 = vmatprep.subr.bf16.mxu1 %v3818_v26  ;;  %v3903_v25 = vld [vmem:[#allocation5 + $0x824] ss:$8 sps:$4 sm:$0xff]   ;;  %v3898_v26 = vld [vmem:[#allocation5 + $0x220] ss:$8 sps:$4 sm:$0xff]  }
  0xaf   :  { %2793 = vmatprep.subr.bf16.mxu0 %v3821_v27  ;;  %v3901_v27 = vld [vmem:[#allocation5 + $0x820] ss:$8 sps:$4 sm:$0xff]  }
  0xb1   :  { %2548 = vmatpush1.bf16.msra.mxu1 %v3816_v28  ;;  %v3906_v28 = vld [vmem:[#allocation5 + $0x234] ss:$8 sps:$4 sm:$0xff]  }
  0xb2   :  { %2794 = vmatpush1.bf16.msra.mxu0 %v3819_v29  ;;  %2549 = vmatprep.subr.bf16.mxu1 %v3824_v30  ;;  %v3909_v29 = vld [vmem:[#allocation5 + $0x834] ss:$8 sps:$4 sm:$0xff]   ;;  %v3904_v30 = vld [vmem:[#allocation5 + $0x230] ss:$8 sps:$4 sm:$0xff]  }
  0xb3   :  { %2795 = vmatprep.subr.bf16.mxu0 %v3827_v31  ;;  %v3907_v31 = vld [vmem:[#allocation5 + $0x830] ss:$8 sps:$4 sm:$0xff]  }
  0xb5   :  { %2550 = vmatpush1.bf16.msra.mxu1 %v3822_v33  ;;  %v3915_v33 = vld [vmem:[#allocation5 + $0x844] ss:$8 sps:$4 sm:$0xff]  }
  0xb6   :  { %2796 = vmatpush1.bf16.msra.mxu0 %v3825_v34  ;;  %2551 = vmatprep.subr.bf16.mxu1 %v3830_v37  ;;  %v3910_v34 = vld [vmem:[#allocation5 + $0x240] ss:$8 sps:$4 sm:$0xff]   ;;  %v3921_v37 = vld [vmem:[#allocation5 + $0x854] ss:$8 sps:$4 sm:$0xff]  }
  0xb7   :  { %2797 = vmatprep.subr.bf16.mxu0 %v3833_v39  ;;  %v3919_v39 = vld [vmem:[#allocation5 + $0x850] ss:$8 sps:$4 sm:$0xff]  }
  0xb9   :  { %2552 = vmatpush1.bf16.msra.mxu1 %v3828_v40  ;;  %v3924_v40 = vld [vmem:[#allocation5 + $0x264] ss:$8 sps:$4 sm:$0xff]  }
  0xba   :  { %2798 = vmatpush1.bf16.msra.mxu0 %v3831_v41  ;;  %2553 = vmatprep.subr.bf16.mxu1 %v3836_v42  ;;  %v3927_v41 = vld [vmem:[#allocation5 + $0x864] ss:$8 sps:$4 sm:$0xff]   ;;  %v3922_v42 = vld [vmem:[#allocation5 + $0x260] ss:$8 sps:$4 sm:$0xff]  }
  0xbb   :  { %2799 = vmatprep.subr.bf16.mxu0 %v3839_v43  ;;  %v3925_v43 = vld [vmem:[#allocation5 + $0x860] ss:$8 sps:$4 sm:$0xff]  }
  0xbd   :  { %2554 = vmatpush1.bf16.msra.mxu1 %v3834_v44  ;;  %v3930_v44 = vld [vmem:[#allocation5 + $0x274] ss:$8 sps:$4 sm:$0xff]  }
  0xbe   :  { %2800 = vmatpush1.bf16.msra.mxu0 %v3837_v45  ;;  %2555 = vmatprep.subr.bf16.mxu1 %v3842_v46  ;;  %v3933_v45 = vld [vmem:[#allocation5 + $0x874] ss:$8 sps:$4 sm:$0xff]   ;;  %v3928_v46 = vld [vmem:[#allocation5 + $0x270] ss:$8 sps:$4 sm:$0xff]  }
  0xbf   :  { %2801 = vmatprep.subr.bf16.mxu0 %v3845_v47  ;;  %v3931_v47 = vld [vmem:[#allocation5 + $0x870] ss:$8 sps:$4 sm:$0xff]  }
  0xc1   :  { %2556 = vmatpush1.bf16.msra.mxu1 %v3840_v48  ;;  %v3936_v48 = vld [vmem:[#allocation5 + $0x284] ss:$8 sps:$4 sm:$0xff]  }
  0xc2   :  { %2802 = vmatpush1.bf16.msra.mxu0 %v3843_v49  ;;  %2557 = vmatprep.subr.bf16.mxu1 %v3848_v50  ;;  %v3939_v49 = vld [vmem:[#allocation5 + $0x884] ss:$8 sps:$4 sm:$0xff]   ;;  %v3934_v50 = vld [vmem:[#allocation5 + $0x280] ss:$8 sps:$4 sm:$0xff]  }
  0xc3   :  { %2803 = vmatprep.subr.bf16.mxu0 %v3851_v51  ;;  %v3937_v51 = vld [vmem:[#allocation5 + $0x880] ss:$8 sps:$4 sm:$0xff]  }
  0xc5   :  { %2558 = vmatpush1.bf16.msra.mxu1 %v3846_v52  ;;  %v3942_v52 = vld [vmem:[#allocation5 + $0x294] ss:$8 sps:$4 sm:$0xff]  }
  0xc6   :  { %2804 = vmatpush1.bf16.msra.mxu0 %v3849_v53  ;;  %2559 = vmatprep.subr.bf16.mxu1 %v3854_v54  ;;  %v3945_v53 = vld [vmem:[#allocation5 + $0x894] ss:$8 sps:$4 sm:$0xff]   ;;  %v3940_v54 = vld [vmem:[#allocation5 + $0x290] ss:$8 sps:$4 sm:$0xff]  }
  0xc7   :  { %2805 = vmatprep.subr.bf16.mxu0 %v3857_v55  ;;  %v3943_v55 = vld [vmem:[#allocation5 + $0x890] ss:$8 sps:$4 sm:$0xff]  }
  0xc9   :  { %2560 = vmatpush1.bf16.msra.mxu1 %v3852_v56  ;;  %v3948_v56 = vld [vmem:[#allocation5 + $0x2a4] ss:$8 sps:$4 sm:$0xff]  }
  0xca   :  { %2806 = vmatpush1.bf16.msra.mxu0 %v3855_v57  ;;  %2561 = vmatprep.subr.bf16.mxu1 %v3860_v58  ;;  %v3951_v57 = vld [vmem:[#allocation5 + $0x8a4] ss:$8 sps:$4 sm:$0xff]   ;;  %v3946_v58 = vld [vmem:[#allocation5 + $0x2a0] ss:$8 sps:$4 sm:$0xff]  }
  0xcb   :  { %2807 = vmatprep.subr.bf16.mxu0 %v3863_v59  ;;  %v3949_v59 = vld [vmem:[#allocation5 + $0x8a0] ss:$8 sps:$4 sm:$0xff]  }
  0xcd   :  { %2562 = vmatpush1.bf16.msra.mxu1 %v3858_v60  ;;  %v3954_v60 = vld [vmem:[#allocation5 + $0x2b4] ss:$8 sps:$4 sm:$0xff]  }
  0xce   :  { %2808 = vmatpush1.bf16.msra.mxu0 %v3861_v61  ;;  %2563 = vmatprep.subr.bf16.mxu1 %v3866_v62  ;;  %v3957_v61 = vld [vmem:[#allocation5 + $0x8b4] ss:$8 sps:$4 sm:$0xff]   ;;  %v3952_v62 = vld [vmem:[#allocation5 + $0x2b0] ss:$8 sps:$4 sm:$0xff]  }
  0xcf   :  { %2809 = vmatprep.subr.bf16.mxu0 %v3869_v63  ;;  %v3955_v63 = vld [vmem:[#allocation5 + $0x8b0] ss:$8 sps:$4 sm:$0xff]  }
  0xd1   :  { %2564 = vmatpush1.bf16.msra.mxu1 %v3864_v0  ;;  %v3960_v0 = vld [vmem:[#allocation5 + $0x2c4] ss:$8 sps:$4 sm:$0xff]  }
  0xd2   :  { %2810 = vmatpush1.bf16.msra.mxu0 %v3867_v1  ;;  %2565 = vmatprep.subr.bf16.mxu1 %v3872_v2  ;;  %v3963_v1 = vld [vmem:[#allocation5 + $0x8c4] ss:$8 sps:$4 sm:$0xff]   ;;  %v3958_v2 = vld [vmem:[#allocation5 + $0x2c0] ss:$8 sps:$4 sm:$0xff]  }
  0xd3   :  { %2811 = vmatprep.subr.bf16.mxu0 %v3875_v3  ;;  %v3961_v3 = vld [vmem:[#allocation5 + $0x8c0] ss:$8 sps:$4 sm:$0xff]  }
  0xd5   :  { %2566 = vmatpush1.bf16.msra.mxu1 %v3870_v4  ;;  %v3966_v4 = vld [vmem:[#allocation5 + $0x2d4] ss:$8 sps:$4 sm:$0xff]  }
  0xd6   :  { %2812 = vmatpush1.bf16.msra.mxu0 %v3873_v5  ;;  %2567 = vmatprep.subr.bf16.mxu1 %v3878_v6  ;;  %v3969_v5 = vld [vmem:[#allocation5 + $0x8d4] ss:$8 sps:$4 sm:$0xff]   ;;  %v3964_v6 = vld [vmem:[#allocation5 + $0x2d0] ss:$8 sps:$4 sm:$0xff]  }
  0xd7   :  { %2813 = vmatprep.subr.bf16.mxu0 %v3881_v7  ;;  %v3967_v7 = vld [vmem:[#allocation5 + $0x8d0] ss:$8 sps:$4 sm:$0xff]  }
  0xd9   :  { %2568 = vmatpush1.bf16.msra.mxu1 %v3876_v8  ;;  %v3972_v8 = vld [vmem:[#allocation5 + $0x2e4] ss:$8 sps:$4 sm:$0xff]  }
  0xda   :  { %2814 = vmatpush1.bf16.msra.mxu0 %v3879_v9  ;;  %2578 = vmatprep.subr.bf16.mxu1 %v3886_v10  ;;  %v3975_v9 = vld [vmem:[#allocation5 + $0x8e4] ss:$8 sps:$4 sm:$0xff]   ;;  %v3970_v10 = vld [vmem:[#allocation5 + $0x2e0] ss:$8 sps:$4 sm:$0xff]  }
  0xdb   :  { %2824 = vmatprep.subr.bf16.mxu0 %v3891_v11  ;;  %v3973_v11 = vld [vmem:[#allocation5 + $0x8e0] ss:$8 sps:$4 sm:$0xff]  }
  0xdc   :  { %2570 = vmatmul.mubr.bf16.vlgmr.msra.gmra.mrb[0].mxu1 %v3187_v12  ;;  %v3978_v12 = vld [vmem:[#allocation5 + $0x2f4] ss:$8 sps:$4 sm:$0xff]  }
  0xdd   :  { %2816 = vmatmul.mubr.bf16.vlgmr.msra.gmra.mrb[0].mxu0 %v3199_v14  ;;  %2579 = vmatpush1.bf16.msra.mxu1 %v3884_v13  ;;  %v3981_v13 = vld [vmem:[#allocation5 + $0x8f4] ss:$8 sps:$4 sm:$0xff]   ;;  %v3976_v14 = vld [vmem:[#allocation5 + $0x2f0] ss:$8 sps:$4 sm:$0xff]  }
  0xde   :  { %2825 = vmatpush1.bf16.msra.mxu0 %v3889_v15  ;;  %2580 = vmatprep.subr.bf16.mxu1 %v3894_v16  ;;  %v3979_v15 = vld [vmem:[#allocation5 + $0x8f0] ss:$8 sps:$4 sm:$0xff]   ;;  %v3986_v16 = vld [vmem:[#allocation5 + $0x304] ss:$8 sps:$4 sm:$0xff]  }
  0xdf   :  { %2826 = vmatprep.subr.bf16.mxu0 %v3897_v17  ;;  %2610 = vmatprep.mubr.bf16.mxu1 %v3190_v19  ;;  %v3991_v17 = vld [vmem:[#allocation5 + $0x904] ss:$8 sps:$4 sm:$0xff]   ;;  %v3984_v19 = vld [vmem:[#allocation5 + $0x300] ss:$8 sps:$4 sm:$0xff]  }
  0xe0   :  { %2856 = vmatprep.mubr.bf16.mxu0 %v3202_v23  ;;  %v3201_v23 = vcombine.low %v4558_v20, %v4558_v20  ;;  %v3995_v20 = vld [vmem:[#allocation5 + $0x910] ss:$8 sps:$4 sm:$0xff]  }
  0xe1   :  { %2581 = vmatpush1.bf16.msra.mxu1 %v3892_v21  ;;  %v3989_v21 = vld [vmem:[#allocation5 + $0x900] ss:$8 sps:$4 sm:$0xff]  }
  0xe2   :  { %2827 = vmatpush1.bf16.msra.mxu0 %v3895_v22  ;;  %2582 = vmatprep.subr.bf16.mxu1 %v3900_v24  ;;  %v3189_v22 = vcombine.low %v4554_v18, %v4554_v18  ;;  %v4566_v24 = vld [vmem:[#allocation2 + $0x18] sm:$0xff] }
  0xe3   :  { %2828 = vmatprep.subr.bf16.mxu0 %v3903_v25  ;;  %v4568_v25 = vld [vmem:[#allocation2 + $0x48] sm:$0xff]  ;;  %v3992_v18 = vld [vmem:[#allocation5 + $0x310] ss:$8 sps:$4 sm:$0xff]  }
  0xe5   :  { %2583 = vmatpush1.bf16.msra.mxu1 %v3898_v26  ;;  %v3994_v26 = vld [vmem:[#allocation5 + $0x314] ss:$8 sps:$4 sm:$0xff]  }
  0xe6   :  { %2829 = vmatpush1.bf16.msra.mxu0 %v3901_v27  ;;  %2584 = vmatprep.subr.bf16.mxu1 %v3906_v28  ;;  %v3997_v27 = vld [vmem:[#allocation5 + $0x914] ss:$8 sps:$4 sm:$0xff]   ;;  %v3192_v28 = vcombine.high %v4566_v24, %v4566_v24 }
  0xe7   :  { %2830 = vmatprep.subr.bf16.mxu0 %v3909_v29  ;;  %v3204_v29 = vcombine.high %v4568_v25, %v4568_v25 }
  0xe9   :  { %2585 = vmatpush1.bf16.msra.mxu1 %v3904_v30  ;;  %v4000_v30 = vld [vmem:[#allocation5 + $0x324] ss:$8 sps:$4 sm:$0xff]  }
  0xea   :  { %2831 = vmatpush1.bf16.msra.mxu0 %v3907_v31  ;;  %2586 = vmatprep.subr.bf16.mxu1 %v3912_v32  ;;  %v4003_v31 = vld [vmem:[#allocation5 + $0x924] ss:$8 sps:$4 sm:$0xff]   ;;  %v3998_v32 = vld [vmem:[#allocation5 + $0x320] ss:$8 sps:$4 sm:$0xff]  }
  0xeb   :  { %2832 = vmatprep.subr.bf16.mxu0 %v3915_v33  ;;  %v4001_v33 = vld [vmem:[#allocation5 + $0x920] ss:$8 sps:$4 sm:$0xff]  }
  0xed   :  { %2587 = vmatpush1.bf16.msra.mxu1 %v3910_v34  ;;  %v4006_v34 = vld [vmem:[#allocation5 + $0x334] ss:$8 sps:$4 sm:$0xff]  }
  0xee   :  { %2833 = vmatpush1.bf16.msra.mxu0 %v3913_v35  ;;  %2588 = vmatprep.subr.bf16.mxu1 %v3918_v36  ;;  %v4009_v35 = vld [vmem:[#allocation5 + $0x934] ss:$8 sps:$4 sm:$0xff]   ;;  %v4004_v36 = vld [vmem:[#allocation5 + $0x330] ss:$8 sps:$4 sm:$0xff]  }
  0xef   :  { %2834 = vmatprep.subr.bf16.mxu0 %v3921_v37  ;;  %v4007_v37 = vld [vmem:[#allocation5 + $0x930] ss:$8 sps:$4 sm:$0xff]  }
  0xf1   :  { %2589 = vmatpush1.bf16.msra.mxu1 %v3916_v38  ;;  %v4012_v38 = vld [vmem:[#allocation5 + $0x344] ss:$8 sps:$4 sm:$0xff]  }
  0xf2   :  { %2835 = vmatpush1.bf16.msra.mxu0 %v3919_v39  ;;  %2590 = vmatprep.subr.bf16.mxu1 %v3924_v40  ;;  %v4015_v39 = vld [vmem:[#allocation5 + $0x944] ss:$8 sps:$4 sm:$0xff]   ;;  %v4010_v40 = vld [vmem:[#allocation5 + $0x340] ss:$8 sps:$4 sm:$0xff]  }
  0xf3   :  { %2836 = vmatprep.subr.bf16.mxu0 %v3927_v41  ;;  %v4013_v41 = vld [vmem:[#allocation5 + $0x940] ss:$8 sps:$4 sm:$0xff]  }
  0xf5   :  { %2591 = vmatpush1.bf16.msra.mxu1 %v3922_v42  ;;  %v4018_v42 = vld [vmem:[#allocation5 + $0x354] ss:$8 sps:$4 sm:$0xff]  }
  0xf6   :  { %2837 = vmatpush1.bf16.msra.mxu0 %v3925_v43  ;;  %2592 = vmatprep.subr.bf16.mxu1 %v3930_v44  ;;  %v4021_v43 = vld [vmem:[#allocation5 + $0x954] ss:$8 sps:$4 sm:$0xff]   ;;  %v4016_v44 = vld [vmem:[#allocation5 + $0x350] ss:$8 sps:$4 sm:$0xff]  }
  0xf7   :  { %2838 = vmatprep.subr.bf16.mxu0 %v3933_v45  ;;  %v4019_v45 = vld [vmem:[#allocation5 + $0x950] ss:$8 sps:$4 sm:$0xff]  }
  0xf9   :  { %2593 = vmatpush1.bf16.msra.mxu1 %v3928_v46  ;;  %v4024_v46 = vld [vmem:[#allocation5 + $0x364] ss:$8 sps:$4 sm:$0xff]  }
  0xfa   :  { %2839 = vmatpush1.bf16.msra.mxu0 %v3931_v47  ;;  %2594 = vmatprep.subr.bf16.mxu1 %v3936_v48  ;;  %v4027_v47 = vld [vmem:[#allocation5 + $0x964] ss:$8 sps:$4 sm:$0xff]   ;;  %v4022_v48 = vld [vmem:[#allocation5 + $0x360] ss:$8 sps:$4 sm:$0xff]  }
  0xfb   :  { %2840 = vmatprep.subr.bf16.mxu0 %v3939_v49  ;;  %v4025_v49 = vld [vmem:[#allocation5 + $0x960] ss:$8 sps:$4 sm:$0xff]  }
  0xfd   :  { %2595 = vmatpush1.bf16.msra.mxu1 %v3934_v50  ;;  %v4030_v50 = vld [vmem:[#allocation5 + $0x374] ss:$8 sps:$4 sm:$0xff]  }
  0xfe   :  { %2841 = vmatpush1.bf16.msra.mxu0 %v3937_v51  ;;  %2596 = vmatprep.subr.bf16.mxu1 %v3942_v52  ;;  %v4033_v51 = vld [vmem:[#allocation5 + $0x974] ss:$8 sps:$4 sm:$0xff]   ;;  %v4028_v52 = vld [vmem:[#allocation5 + $0x370] ss:$8 sps:$4 sm:$0xff]  }
  0xff   :  { %2842 = vmatprep.subr.bf16.mxu0 %v3945_v53  ;;  %v4031_v53 = vld [vmem:[#allocation5 + $0x970] ss:$8 sps:$4 sm:$0xff]  }
 0x101   :  { %2597 = vmatpush1.bf16.msra.mxu1 %v3940_v54  ;;  %v4036_v54 = vld [vmem:[#allocation5 + $0x384] ss:$8 sps:$4 sm:$0xff]  }
 0x102   :  { %2843 = vmatpush1.bf16.msra.mxu0 %v3943_v55  ;;  %2598 = vmatprep.subr.bf16.mxu1 %v3948_v56  ;;  %v4039_v55 = vld [vmem:[#allocation5 + $0x984] ss:$8 sps:$4 sm:$0xff]   ;;  %v4034_v56 = vld [vmem:[#allocation5 + $0x380] ss:$8 sps:$4 sm:$0xff]  }
 0x103   :  { %2844 = vmatprep.subr.bf16.mxu0 %v3951_v57  ;;  %v4037_v57 = vld [vmem:[#allocation5 + $0x980] ss:$8 sps:$4 sm:$0xff]  }
 0x105   :  { %2599 = vmatpush1.bf16.msra.mxu1 %v3946_v58  ;;  %v4042_v58 = vld [vmem:[#allocation5 + $0x394] ss:$8 sps:$4 sm:$0xff]  }
 0x106   :  { %2845 = vmatpush1.bf16.msra.mxu0 %v3949_v59  ;;  %2600 = vmatprep.subr.bf16.mxu1 %v3954_v60  ;;  %v4045_v59 = vld [vmem:[#allocation5 + $0x994] ss:$8 sps:$4 sm:$0xff]   ;;  %v4040_v60 = vld [vmem:[#allocation5 + $0x390] ss:$8 sps:$4 sm:$0xff]  }
 0x107   :  { %2846 = vmatprep.subr.bf16.mxu0 %v3957_v61  ;;  %v4043_v61 = vld [vmem:[#allocation5 + $0x990] ss:$8 sps:$4 sm:$0xff]  }
 0x109   :  { %2601 = vmatpush1.bf16.msra.mxu1 %v3952_v62  ;;  %v4048_v62 = vld [vmem:[#allocation5 + $0x3a4] ss:$8 sps:$4 sm:$0xff]  }
 0x10a   :  { %2847 = vmatpush1.bf16.msra.mxu0 %v3955_v63  ;;  %2602 = vmatprep.subr.bf16.mxu1 %v3960_v0  ;;  %v4051_v63 = vld [vmem:[#allocation5 + $0x9a4] ss:$8 sps:$4 sm:$0xff]   ;;  %v4046_v0 = vld [vmem:[#allocation5 + $0x3a0] ss:$8 sps:$4 sm:$0xff]  }
 0x10b   :  { %2848 = vmatprep.subr.bf16.mxu0 %v3963_v1  ;;  %v4049_v1 = vld [vmem:[#allocation5 + $0x9a0] ss:$8 sps:$4 sm:$0xff]  }
 0x10d   :  { %2603 = vmatpush1.bf16.msra.mxu1 %v3958_v2  ;;  %v4054_v2 = vld [vmem:[#allocation5 + $0x3b4] ss:$8 sps:$4 sm:$0xff]  }
 0x10e   :  { %2849 = vmatpush1.bf16.msra.mxu0 %v3961_v3  ;;  %2604 = vmatprep.subr.bf16.mxu1 %v3966_v4  ;;  %v4057_v3 = vld [vmem:[#allocation5 + $0x9b4] ss:$8 sps:$4 sm:$0xff]   ;;  %v4052_v4 = vld [vmem:[#allocation5 + $0x3b0] ss:$8 sps:$4 sm:$0xff]  }
 0x10f   :  { %2850 = vmatprep.subr.bf16.mxu0 %v3969_v5  ;;  %v4055_v5 = vld [vmem:[#allocation5 + $0x9b0] ss:$8 sps:$4 sm:$0xff]  }
 0x111   :  { %2605 = vmatpush1.bf16.msra.mxu1 %v3964_v6  ;;  %v4060_v6 = vld [vmem:[#allocation5 + $0x3c4] ss:$8 sps:$4 sm:$0xff]  }
 0x112   :  { %2851 = vmatpush1.bf16.msra.mxu0 %v3967_v7  ;;  %2606 = vmatprep.subr.bf16.mxu1 %v3972_v8  ;;  %v4063_v7 = vld [vmem:[#allocation5 + $0x9c4] ss:$8 sps:$4 sm:$0xff]   ;;  %v4058_v8 = vld [vmem:[#allocation5 + $0x3c0] ss:$8 sps:$4 sm:$0xff]  }
 0x113   :  { %2852 = vmatprep.subr.bf16.mxu0 %v3975_v9  ;;  %v4061_v9 = vld [vmem:[#allocation5 + $0x9c0] ss:$8 sps:$4 sm:$0xff]  }
 0x115   :  { %2607 = vmatpush1.bf16.msra.mxu1 %v3970_v10  ;;  %v4066_v10 = vld [vmem:[#allocation5 + $0x3d4] ss:$8 sps:$4 sm:$0xff]  }
 0x116   :  { %2853 = vmatpush1.bf16.msra.mxu0 %v3973_v11  ;;  %2608 = vmatprep.subr.bf16.mxu1 %v3978_v12  ;;  %v4069_v11 = vld [vmem:[#allocation5 + $0x9d4] ss:$8 sps:$4 sm:$0xff]   ;;  %v4064_v12 = vld [vmem:[#allocation5 + $0x3d0] ss:$8 sps:$4 sm:$0xff]  }
 0x117   :  { %2854 = vmatprep.subr.bf16.mxu0 %v3981_v13  ;;  %v4067_v13 = vld [vmem:[#allocation5 + $0x9d0] ss:$8 sps:$4 sm:$0xff]  }
 0x119   :  { %2609 = vmatpush1.bf16.msra.mxu1 %v3976_v14  ;;  %v4072_v14 = vld [vmem:[#allocation5 + $0x3e4] ss:$8 sps:$4 sm:$0xff]  }
 0x11a   :  { %2855 = vmatpush1.bf16.msra.mxu0 %v3979_v15  ;;  %2619 = vmatprep.subr.bf16.mxu1 %v3986_v16  ;;  %v4075_v15 = vld [vmem:[#allocation5 + $0x9e4] ss:$8 sps:$4 sm:$0xff]   ;;  %v4070_v16 = vld [vmem:[#allocation5 + $0x3e0] ss:$8 sps:$4 sm:$0xff]  }
 0x11b   :  { %2865 = vmatprep.subr.bf16.mxu0 %v3991_v17  ;;  %v4073_v17 = vld [vmem:[#allocation5 + $0x9e0] ss:$8 sps:$4 sm:$0xff]  }
 0x11c   :  { %2611 = vmatmul.mubr.bf16.vlgmr.msra.gmra.mrb[0].mxu1 %v3189_v22  ;;  %v4076_v22 = vld [vmem:[#allocation5 + $0x3f0] ss:$8 sps:$4 sm:$0xff]  }
 0x11d   :  { %2857 = vmatmul.mubr.bf16.vlgmr.msra.gmra.mrb[0].mxu0 %v3201_v23  ;;  %2620 = vmatpush1.bf16.msra.mxu1 %v3984_v19  ;;  %v4078_v19 = vld [vmem:[#allocation5 + $0x3f4] ss:$8 sps:$4 sm:$0xff]   ;;  %v4079_v23 = vld [vmem:[#allocation5 + $0x9f0] ss:$8 sps:$4 sm:$0xff]  }
 0x11e   :  { %2866 = vmatpush1.bf16.msra.mxu0 %v3989_v21  ;;  %2621 = vmatprep.subr.bf16.mxu1 %v3994_v26  ;;  %v4081_v21 = vld [vmem:[#allocation5 + $0x9f4] ss:$8 sps:$4 sm:$0xff]   ;;  %v4086_v26 = vld [vmem:[#allocation5 + $0x404] ss:$8 sps:$4 sm:$0xff]  }
 0x11f   :  { %2867 = vmatprep.subr.bf16.mxu0 %v3997_v27  ;;  %2651 = vmatprep.mubr.bf16.mxu1 %v3192_v28  ;;  %v4091_v27 = vld [vmem:[#allocation5 + $0xa04] ss:$8 sps:$4 sm:$0xff]  }
 0x120   :  { %2897 = vmatprep.mubr.bf16.mxu0 %v3204_v29  ;;  %v4574_v28 = vld [vmem:[#allocation2 + $0x20] sm:$0xff]  ;;  %v3191_v29 = vcombine.low %v4566_v24, %v4566_v24  ;;  %v4092_v24 = vld [vmem:[#allocation5 + $0x410] ss:$8 sps:$4 sm:$0xff]  }
 0x121   :  { %2622 = vmatpush1.bf16.msra.mxu1 %v3992_v18  ;;  %v3203_v18 = vcombine.low %v4568_v25, %v4568_v25  ;;  %v4095_v25 = vld [vmem:[#allocation5 + $0xa10] ss:$8 sps:$4 sm:$0xff]  }
 0x122   :  { %2868 = vmatpush1.bf16.msra.mxu0 %v3995_v20  ;;  %2623 = vmatprep.subr.bf16.mxu1 %v4000_v30  ;;  %v4580_v20 = vld [vmem:[#allocation2 + $0x50] sm:$0xff]  ;;  %v4084_v30 = vld [vmem:[#allocation5 + $0x400] ss:$8 sps:$4 sm:$0xff]  }
 0x123   :  { %2869 = vmatprep.subr.bf16.mxu0 %v4003_v31  ;;  %v4089_v31 = vld [vmem:[#allocation5 + $0xa00] ss:$8 sps:$4 sm:$0xff]  }
 0x125   :  { %2624 = vmatpush1.bf16.msra.mxu1 %v3998_v32  ;;  %v4094_v32 = vld [vmem:[#allocation5 + $0x414] ss:$8 sps:$4 sm:$0xff]  }
 0x126   :  { %2870 = vmatpush1.bf16.msra.mxu0 %v4001_v33  ;;  %2625 = vmatprep.subr.bf16.mxu1 %v4006_v34  ;;  %v4097_v33 = vld [vmem:[#allocation5 + $0xa14] ss:$8 sps:$4 sm:$0xff]   ;;  %v3194_v34 = vcombine.high %v4574_v28, %v4574_v28 }
 0x127   :  { %2871 = vmatprep.subr.bf16.mxu0 %v4009_v35  ;;  %v3206_v35 = vcombine.high %v4580_v20, %v4580_v20 }
 0x129   :  { %2626 = vmatpush1.bf16.msra.mxu1 %v4004_v36  ;;  %v4100_v36 = vld [vmem:[#allocation5 + $0x424] ss:$8 sps:$4 sm:$0xff]  }
 0x12a   :  { %2872 = vmatpush1.bf16.msra.mxu0 %v4007_v37  ;;  %2627 = vmatprep.subr.bf16.mxu1 %v4012_v38  ;;  %v4103_v37 = vld [vmem:[#allocation5 + $0xa24] ss:$8 sps:$4 sm:$0xff]   ;;  %v4098_v38 = vld [vmem:[#allocation5 + $0x420] ss:$8 sps:$4 sm:$0xff]  }
 0x12b   :  { %2873 = vmatprep.subr.bf16.mxu0 %v4015_v39  ;;  %v4101_v39 = vld [vmem:[#allocation5 + $0xa20] ss:$8 sps:$4 sm:$0xff]  }
 0x12d   :  { %2628 = vmatpush1.bf16.msra.mxu1 %v4010_v40  ;;  %v4106_v40 = vld [vmem:[#allocation5 + $0x434] ss:$8 sps:$4 sm:$0xff]  }
 0x12e   :  { %2874 = vmatpush1.bf16.msra.mxu0 %v4013_v41  ;;  %2629 = vmatprep.subr.bf16.mxu1 %v4018_v42  ;;  %v4109_v41 = vld [vmem:[#allocation5 + $0xa34] ss:$8 sps:$4 sm:$0xff]   ;;  %v4104_v42 = vld [vmem:[#allocation5 + $0x430] ss:$8 sps:$4 sm:$0xff]  }
 0x12f   :  { %2875 = vmatprep.subr.bf16.mxu0 %v4021_v43  ;;  %v4107_v43 = vld [vmem:[#allocation5 + $0xa30] ss:$8 sps:$4 sm:$0xff]  }
 0x131   :  { %2630 = vmatpush1.bf16.msra.mxu1 %v4016_v44  ;;  %v4112_v44 = vld [vmem:[#allocation5 + $0x444] ss:$8 sps:$4 sm:$0xff]  }
 0x132   :  { %2876 = vmatpush1.bf16.msra.mxu0 %v4019_v45  ;;  %2631 = vmatprep.subr.bf16.mxu1 %v4024_v46  ;;  %v4115_v45 = vld [vmem:[#allocation5 + $0xa44] ss:$8 sps:$4 sm:$0xff]   ;;  %v4110_v46 = vld [vmem:[#allocation5 + $0x440] ss:$8 sps:$4 sm:$0xff]  }
 0x133   :  { %2877 = vmatprep.subr.bf16.mxu0 %v4027_v47  ;;  %v4113_v47 = vld [vmem:[#allocation5 + $0xa40] ss:$8 sps:$4 sm:$0xff]  }
 0x135   :  { %2632 = vmatpush1.bf16.msra.mxu1 %v4022_v48  ;;  %v4118_v48 = vld [vmem:[#allocation5 + $0x454] ss:$8 sps:$4 sm:$0xff]  }
 0x136   :  { %2878 = vmatpush1.bf16.msra.mxu0 %v4025_v49  ;;  %2633 = vmatprep.subr.bf16.mxu1 %v4030_v50  ;;  %v4121_v49 = vld [vmem:[#allocation5 + $0xa54] ss:$8 sps:$4 sm:$0xff]   ;;  %v4116_v50 = vld [vmem:[#allocation5 + $0x450] ss:$8 sps:$4 sm:$0xff]  }
 0x137   :  { %2879 = vmatprep.subr.bf16.mxu0 %v4033_v51  ;;  %v4119_v51 = vld [vmem:[#allocation5 + $0xa50] ss:$8 sps:$4 sm:$0xff]  }
 0x139   :  { %2634 = vmatpush1.bf16.msra.mxu1 %v4028_v52  ;;  %v4124_v52 = vld [vmem:[#allocation5 + $0x464] ss:$8 sps:$4 sm:$0xff]  }
 0x13a   :  { %2880 = vmatpush1.bf16.msra.mxu0 %v4031_v53  ;;  %2635 = vmatprep.subr.bf16.mxu1 %v4036_v54  ;;  %v4127_v53 = vld [vmem:[#allocation5 + $0xa64] ss:$8 sps:$4 sm:$0xff]   ;;  %v4122_v54 = vld [vmem:[#allocation5 + $0x460] ss:$8 sps:$4 sm:$0xff]  }
 0x13b   :  { %2881 = vmatprep.subr.bf16.mxu0 %v4039_v55  ;;  %v4125_v55 = vld [vmem:[#allocation5 + $0xa60] ss:$8 sps:$4 sm:$0xff]  }
 0x13d   :  { %2636 = vmatpush1.bf16.msra.mxu1 %v4034_v56  ;;  %v4130_v56 = vld [vmem:[#allocation5 + $0x474] ss:$8 sps:$4 sm:$0xff]  }
 0x13e   :  { %2882 = vmatpush1.bf16.msra.mxu0 %v4037_v57  ;;  %2637 = vmatprep.subr.bf16.mxu1 %v4042_v58  ;;  %v4133_v57 = vld [vmem:[#allocation5 + $0xa74] ss:$8 sps:$4 sm:$0xff]   ;;  %v4128_v58 = vld [vmem:[#allocation5 + $0x470] ss:$8 sps:$4 sm:$0xff]  }
 0x13f   :  { %2883 = vmatprep.subr.bf16.mxu0 %v4045_v59  ;;  %v4131_v59 = vld [vmem:[#allocation5 + $0xa70] ss:$8 sps:$4 sm:$0xff]  }
 0x141   :  { %2638 = vmatpush1.bf16.msra.mxu1 %v4040_v60  ;;  %v4136_v60 = vld [vmem:[#allocation5 + $0x484] ss:$8 sps:$4 sm:$0xff]  }
 0x142   :  { %2884 = vmatpush1.bf16.msra.mxu0 %v4043_v61  ;;  %2639 = vmatprep.subr.bf16.mxu1 %v4048_v62  ;;  %v4139_v61 = vld [vmem:[#allocation5 + $0xa84] ss:$8 sps:$4 sm:$0xff]   ;;  %v4134_v62 = vld [vmem:[#allocation5 + $0x480] ss:$8 sps:$4 sm:$0xff]  }
 0x143   :  { %2885 = vmatprep.subr.bf16.mxu0 %v4051_v63  ;;  %v4137_v63 = vld [vmem:[#allocation5 + $0xa80] ss:$8 sps:$4 sm:$0xff]  }
 0x145   :  { %2640 = vmatpush1.bf16.msra.mxu1 %v4046_v0  ;;  %v4142_v0 = vld [vmem:[#allocation5 + $0x494] ss:$8 sps:$4 sm:$0xff]  }
 0x146   :  { %2886 = vmatpush1.bf16.msra.mxu0 %v4049_v1  ;;  %2641 = vmatprep.subr.bf16.mxu1 %v4054_v2  ;;  %v4145_v1 = vld [vmem:[#allocation5 + $0xa94] ss:$8 sps:$4 sm:$0xff]   ;;  %v4140_v2 = vld [vmem:[#allocation5 + $0x490] ss:$8 sps:$4 sm:$0xff]  }
 0x147   :  { %2887 = vmatprep.subr.bf16.mxu0 %v4057_v3  ;;  %v4143_v3 = vld [vmem:[#allocation5 + $0xa90] ss:$8 sps:$4 sm:$0xff]  }
 0x149   :  { %2642 = vmatpush1.bf16.msra.mxu1 %v4052_v4  ;;  %v4148_v4 = vld [vmem:[#allocation5 + $0x4a4] ss:$8 sps:$4 sm:$0xff]  }
 0x14a   :  { %2888 = vmatpush1.bf16.msra.mxu0 %v4055_v5  ;;  %2643 = vmatprep.subr.bf16.mxu1 %v4060_v6  ;;  %v4151_v5 = vld [vmem:[#allocation5 + $0xaa4] ss:$8 sps:$4 sm:$0xff]   ;;  %v4146_v6 = vld [vmem:[#allocation5 + $0x4a0] ss:$8 sps:$4 sm:$0xff]  }
 0x14b   :  { %2889 = vmatprep.subr.bf16.mxu0 %v4063_v7  ;;  %v4149_v7 = vld [vmem:[#allocation5 + $0xaa0] ss:$8 sps:$4 sm:$0xff]  }
 0x14d   :  { %2644 = vmatpush1.bf16.msra.mxu1 %v4058_v8  ;;  %v4154_v8 = vld [vmem:[#allocation5 + $0x4b4] ss:$8 sps:$4 sm:$0xff]  }
 0x14e   :  { %2890 = vmatpush1.bf16.msra.mxu0 %v4061_v9  ;;  %2645 = vmatprep.subr.bf16.mxu1 %v4066_v10  ;;  %v4157_v9 = vld [vmem:[#allocation5 + $0xab4] ss:$8 sps:$4 sm:$0xff]   ;;  %v4152_v10 = vld [vmem:[#allocation5 + $0x4b0] ss:$8 sps:$4 sm:$0xff]  }
 0x14f   :  { %2891 = vmatprep.subr.bf16.mxu0 %v4069_v11  ;;  %v4155_v11 = vld [vmem:[#allocation5 + $0xab0] ss:$8 sps:$4 sm:$0xff]  }
 0x151   :  { %2646 = vmatpush1.bf16.msra.mxu1 %v4064_v12  ;;  %v4160_v12 = vld [vmem:[#allocation5 + $0x4c4] ss:$8 sps:$4 sm:$0xff]  }
 0x152   :  { %2892 = vmatpush1.bf16.msra.mxu0 %v4067_v13  ;;  %2647 = vmatprep.subr.bf16.mxu1 %v4072_v14  ;;  %v4163_v13 = vld [vmem:[#allocation5 + $0xac4] ss:$8 sps:$4 sm:$0xff]   ;;  %v4158_v14 = vld [vmem:[#allocation5 + $0x4c0] ss:$8 sps:$4 sm:$0xff]  }
 0x153   :  { %2893 = vmatprep.subr.bf16.mxu0 %v4075_v15  ;;  %v4161_v15 = vld [vmem:[#allocation5 + $0xac0] ss:$8 sps:$4 sm:$0xff]  }
 0x155   :  { %2648 = vmatpush1.bf16.msra.mxu1 %v4070_v16  ;;  %v4166_v16 = vld [vmem:[#allocation5 + $0x4d4] ss:$8 sps:$4 sm:$0xff]  }
 0x156   :  { %2894 = vmatpush1.bf16.msra.mxu0 %v4073_v17  ;;  %2649 = vmatprep.subr.bf16.mxu1 %v4078_v19  ;;  %v4169_v17 = vld [vmem:[#allocation5 + $0xad4] ss:$8 sps:$4 sm:$0xff]   ;;  %v4164_v19 = vld [vmem:[#allocation5 + $0x4d0] ss:$8 sps:$4 sm:$0xff]  }
 0x157   :  { %2895 = vmatprep.subr.bf16.mxu0 %v4081_v21  ;;  %v4167_v21 = vld [vmem:[#allocation5 + $0xad0] ss:$8 sps:$4 sm:$0xff]  }
 0x159   :  { %2650 = vmatpush1.bf16.msra.mxu1 %v4076_v22  ;;  %v4172_v22 = vld [vmem:[#allocation5 + $0x4e4] ss:$8 sps:$4 sm:$0xff]  }
 0x15a   :  { %2896 = vmatpush1.bf16.msra.mxu0 %v4079_v23  ;;  %2660 = vmatprep.subr.bf16.mxu1 %v4086_v26  ;;  %v4175_v23 = vld [vmem:[#allocation5 + $0xae4] ss:$8 sps:$4 sm:$0xff]   ;;  %v4170_v26 = vld [vmem:[#allocation5 + $0x4e0] ss:$8 sps:$4 sm:$0xff]  }
 0x15b   :  { %2906 = vmatprep.subr.bf16.mxu0 %v4091_v27  ;;  %v4173_v27 = vld [vmem:[#allocation5 + $0xae0] ss:$8 sps:$4 sm:$0xff]  }
 0x15c   :  { %2652 = vmatmul.mubr.bf16.vlgmr.msra.gmra.mrb[0].mxu1 %v3191_v29  ;;  %v4178_v29 = vld [vmem:[#allocation5 + $0x4f4] ss:$8 sps:$4 sm:$0xff]  }
 0x15d   :  { %2898 = vmatmul.mubr.bf16.vlgmr.msra.gmra.mrb[0].mxu0 %v3203_v18  ;;  %2661 = vmatpush1.bf16.msra.mxu1 %v4084_v30  ;;  %v4181_v18 = vld [vmem:[#allocation5 + $0xaf4] ss:$8 sps:$4 sm:$0xff]   ;;  %v4176_v30 = vld [vmem:[#allocation5 + $0x4f0] ss:$8 sps:$4 sm:$0xff]  }
 0x15e   :  { %2907 = vmatpush1.bf16.msra.mxu0 %v4089_v31  ;;  %2662 = vmatprep.subr.bf16.mxu1 %v4094_v32  ;;  %v4179_v31 = vld [vmem:[#allocation5 + $0xaf0] ss:$8 sps:$4 sm:$0xff]   ;;  %v4186_v32 = vld [vmem:[#allocation5 + $0x504] ss:$8 sps:$4 sm:$0xff]  }
 0x15f   :  { %2908 = vmatprep.subr.bf16.mxu0 %v4097_v33  ;;  %2692 = vmatprep.mubr.bf16.mxu1 %v3194_v34  ;;  %v4191_v33 = vld [vmem:[#allocation5 + $0xb04] ss:$8 sps:$4 sm:$0xff]   ;;  %v3193_v34 = vcombine.low %v4574_v28, %v4574_v28 }
 0x160   :  { %2938 = vmatprep.mubr.bf16.mxu0 %v3206_v35  ;;  %v3205_v35 = vcombine.low %v4580_v20, %v4580_v20  ;;  %v4192_v20 = vld [vmem:[#allocation5 + $0x510] ss:$8 sps:$4 sm:$0xff]  }
 0x161   :  { %2663 = vmatpush1.bf16.msra.mxu1 %v4092_v24  ;;  %v4590_v24 = vld [vmem:[#allocation2 + $0x28] sm:$0xff] }
 0x162   :  { %2909 = vmatpush1.bf16.msra.mxu0 %v4095_v25  ;;  %2664 = vmatprep.subr.bf16.mxu1 %v4100_v36  ;;  %v4592_v25 = vld [vmem:[#allocation2 + $0x58] sm:$0xff]  ;;  %v4184_v36 = vld [vmem:[#allocation5 + $0x500] ss:$8 sps:$4 sm:$0xff]  }
 0x163   :  { %2910 = vmatprep.subr.bf16.mxu0 %v4103_v37  ;;  %v4189_v37 = vld [vmem:[#allocation5 + $0xb00] ss:$8 sps:$4 sm:$0xff]   ;;  %v3208_v28 = vcombine.high %v4592_v25, %v4592_v25 }
 0x165   :  { %2665 = vmatpush1.bf16.msra.mxu1 %v4098_v38  ;;  %v4194_v38 = vld [vmem:[#allocation5 + $0x514] ss:$8 sps:$4 sm:$0xff]  }
 0x166   :  { %2911 = vmatpush1.bf16.msra.mxu0 %v4101_v39  ;;  %2666 = vmatprep.subr.bf16.mxu1 %v4106_v40  ;;  %v4197_v39 = vld [vmem:[#allocation5 + $0xb14] ss:$8 sps:$4 sm:$0xff]   ;;  %v3196_v40 = vcombine.high %v4590_v24, %v4590_v24 }
 0x167   :  { %2912 = vmatprep.subr.bf16.mxu0 %v4109_v41  ;;  %v4195_v41 = vld [vmem:[#allocation5 + $0xb10] ss:$8 sps:$4 sm:$0xff]  }
 0x169   :  { %2667 = vmatpush1.bf16.msra.mxu1 %v4104_v42  ;;  %v4200_v42 = vld [vmem:[#allocation5 + $0x524] ss:$8 sps:$4 sm:$0xff]  }
 0x16a   :  { %2913 = vmatpush1.bf16.msra.mxu0 %v4107_v43  ;;  %2668 = vmatprep.subr.bf16.mxu1 %v4112_v44  ;;  %v4203_v43 = vld [vmem:[#allocation5 + $0xb24] ss:$8 sps:$4 sm:$0xff]   ;;  %v4198_v44 = vld [vmem:[#allocation5 + $0x520] ss:$8 sps:$4 sm:$0xff]  }
 0x16b   :  { %2914 = vmatprep.subr.bf16.mxu0 %v4115_v45  ;;  %v4201_v45 = vld [vmem:[#allocation5 + $0xb20] ss:$8 sps:$4 sm:$0xff]  }
 0x16d   :  { %2669 = vmatpush1.bf16.msra.mxu1 %v4110_v46  ;;  %v4206_v46 = vld [vmem:[#allocation5 + $0x534] ss:$8 sps:$4 sm:$0xff]  }
 0x16e   :  { %2915 = vmatpush1.bf16.msra.mxu0 %v4113_v47  ;;  %2670 = vmatprep.subr.bf16.mxu1 %v4118_v48  ;;  %v4209_v47 = vld [vmem:[#allocation5 + $0xb34] ss:$8 sps:$4 sm:$0xff]   ;;  %v4204_v48 = vld [vmem:[#allocation5 + $0x530] ss:$8 sps:$4 sm:$0xff]  }
 0x16f   :  { %2916 = vmatprep.subr.bf16.mxu0 %v4121_v49  ;;  %v4207_v49 = vld [vmem:[#allocation5 + $0xb30] ss:$8 sps:$4 sm:$0xff]  }
 0x171   :  { %2671 = vmatpush1.bf16.msra.mxu1 %v4116_v50  ;;  %v4212_v50 = vld [vmem:[#allocation5 + $0x544] ss:$8 sps:$4 sm:$0xff]  }
 0x172   :  { %2917 = vmatpush1.bf16.msra.mxu0 %v4119_v51  ;;  %2672 = vmatprep.subr.bf16.mxu1 %v4124_v52  ;;  %v4215_v51 = vld [vmem:[#allocation5 + $0xb44] ss:$8 sps:$4 sm:$0xff]   ;;  %v4210_v52 = vld [vmem:[#allocation5 + $0x540] ss:$8 sps:$4 sm:$0xff]  }
 0x173   :  { %2918 = vmatprep.subr.bf16.mxu0 %v4127_v53  ;;  %v4213_v53 = vld [vmem:[#allocation5 + $0xb40] ss:$8 sps:$4 sm:$0xff]  }
 0x175   :  { %2673 = vmatpush1.bf16.msra.mxu1 %v4122_v54  ;;  %v4218_v54 = vld [vmem:[#allocation5 + $0x554] ss:$8 sps:$4 sm:$0xff]  }
 0x176   :  { %2919 = vmatpush1.bf16.msra.mxu0 %v4125_v55  ;;  %2674 = vmatprep.subr.bf16.mxu1 %v4130_v56  ;;  %v4221_v55 = vld [vmem:[#allocation5 + $0xb54] ss:$8 sps:$4 sm:$0xff]   ;;  %v4216_v56 = vld [vmem:[#allocation5 + $0x550] ss:$8 sps:$4 sm:$0xff]  }
 0x177   :  { %2920 = vmatprep.subr.bf16.mxu0 %v4133_v57  ;;  %v4219_v57 = vld [vmem:[#allocation5 + $0xb50] ss:$8 sps:$4 sm:$0xff]  }
 0x179   :  { %2675 = vmatpush1.bf16.msra.mxu1 %v4128_v58  ;;  %v4224_v58 = vld [vmem:[#allocation5 + $0x564] ss:$8 sps:$4 sm:$0xff]  }
 0x17a   :  { %2921 = vmatpush1.bf16.msra.mxu0 %v4131_v59  ;;  %2676 = vmatprep.subr.bf16.mxu1 %v4136_v60  ;;  %v4227_v59 = vld [vmem:[#allocation5 + $0xb64] ss:$8 sps:$4 sm:$0xff]   ;;  %v4222_v60 = vld [vmem:[#allocation5 + $0x560] ss:$8 sps:$4 sm:$0xff]  }
 0x17b   :  { %2922 = vmatprep.subr.bf16.mxu0 %v4139_v61  ;;  %v4225_v61 = vld [vmem:[#allocation5 + $0xb60] ss:$8 sps:$4 sm:$0xff]  }
 0x17d   :  { %2677 = vmatpush1.bf16.msra.mxu1 %v4134_v62  ;;  %v4230_v62 = vld [vmem:[#allocation5 + $0x574] ss:$8 sps:$4 sm:$0xff]  }
 0x17e   :  { %2923 = vmatpush1.bf16.msra.mxu0 %v4137_v63  ;;  %2678 = vmatprep.subr.bf16.mxu1 %v4142_v0  ;;  %v4233_v63 = vld [vmem:[#allocation5 + $0xb74] ss:$8 sps:$4 sm:$0xff]   ;;  %v4228_v0 = vld [vmem:[#allocation5 + $0x570] ss:$8 sps:$4 sm:$0xff]  }
 0x17f   :  { %2924 = vmatprep.subr.bf16.mxu0 %v4145_v1  ;;  %v4231_v1 = vld [vmem:[#allocation5 + $0xb70] ss:$8 sps:$4 sm:$0xff]  }
 0x181   :  { %2679 = vmatpush1.bf16.msra.mxu1 %v4140_v2  ;;  %v4236_v2 = vld [vmem:[#allocation5 + $0x584] ss:$8 sps:$4 sm:$0xff]  }
 0x182   :  { %2925 = vmatpush1.bf16.msra.mxu0 %v4143_v3  ;;  %2680 = vmatprep.subr.bf16.mxu1 %v4148_v4  ;;  %v4239_v3 = vld [vmem:[#allocation5 + $0xb84] ss:$8 sps:$4 sm:$0xff]   ;;  %v4234_v4 = vld [vmem:[#allocation5 + $0x580] ss:$8 sps:$4 sm:$0xff]  }
 0x183   :  { %2926 = vmatprep.subr.bf16.mxu0 %v4151_v5  ;;  %v4237_v5 = vld [vmem:[#allocation5 + $0xb80] ss:$8 sps:$4 sm:$0xff]  }
 0x185   :  { %2681 = vmatpush1.bf16.msra.mxu1 %v4146_v6  ;;  %v4242_v6 = vld [vmem:[#allocation5 + $0x594] ss:$8 sps:$4 sm:$0xff]  }
 0x186   :  { %2927 = vmatpush1.bf16.msra.mxu0 %v4149_v7  ;;  %2682 = vmatprep.subr.bf16.mxu1 %v4154_v8  ;;  %v4245_v7 = vld [vmem:[#allocation5 + $0xb94] ss:$8 sps:$4 sm:$0xff]   ;;  %v4240_v8 = vld [vmem:[#allocation5 + $0x590] ss:$8 sps:$4 sm:$0xff]  }
 0x187   :  { %2928 = vmatprep.subr.bf16.mxu0 %v4157_v9  ;;  %v4243_v9 = vld [vmem:[#allocation5 + $0xb90] ss:$8 sps:$4 sm:$0xff]  }
 0x189   :  { %2683 = vmatpush1.bf16.msra.mxu1 %v4152_v10  ;;  %v4248_v10 = vld [vmem:[#allocation5 + $0x5a4] ss:$8 sps:$4 sm:$0xff]  }
 0x18a   :  { %2929 = vmatpush1.bf16.msra.mxu0 %v4155_v11  ;;  %2684 = vmatprep.subr.bf16.mxu1 %v4160_v12  ;;  %v4251_v11 = vld [vmem:[#allocation5 + $0xba4] ss:$8 sps:$4 sm:$0xff]   ;;  %v4246_v12 = vld [vmem:[#allocation5 + $0x5a0] ss:$8 sps:$4 sm:$0xff]  }
 0x18b   :  { %2930 = vmatprep.subr.bf16.mxu0 %v4163_v13  ;;  %v4249_v13 = vld [vmem:[#allocation5 + $0xba0] ss:$8 sps:$4 sm:$0xff]  }
 0x18d   :  { %2685 = vmatpush1.bf16.msra.mxu1 %v4158_v14  ;;  %v4254_v14 = vld [vmem:[#allocation5 + $0x5b4] ss:$8 sps:$4 sm:$0xff]  }
 0x18e   :  { %2931 = vmatpush1.bf16.msra.mxu0 %v4161_v15  ;;  %2686 = vmatprep.subr.bf16.mxu1 %v4166_v16  ;;  %v4257_v15 = vld [vmem:[#allocation5 + $0xbb4] ss:$8 sps:$4 sm:$0xff]   ;;  %v4252_v16 = vld [vmem:[#allocation5 + $0x5b0] ss:$8 sps:$4 sm:$0xff]  }
 0x18f   :  { %2932 = vmatprep.subr.bf16.mxu0 %v4169_v17  ;;  %v4255_v17 = vld [vmem:[#allocation5 + $0xbb0] ss:$8 sps:$4 sm:$0xff]  }
 0x191   :  { %2687 = vmatpush1.bf16.msra.mxu1 %v4164_v19  ;;  %v4260_v19 = vld [vmem:[#allocation5 + $0x5c4] ss:$8 sps:$4 sm:$0xff]  }
 0x192   :  { %2933 = vmatpush1.bf16.msra.mxu0 %v4167_v21  ;;  %2688 = vmatprep.subr.bf16.mxu1 %v4172_v22  ;;  %v4263_v21 = vld [vmem:[#allocation5 + $0xbc4] ss:$8 sps:$4 sm:$0xff]   ;;  %v4258_v22 = vld [vmem:[#allocation5 + $0x5c0] ss:$8 sps:$4 sm:$0xff]  }
 0x193   :  { %2934 = vmatprep.subr.bf16.mxu0 %v4175_v23  ;;  %v4261_v23 = vld [vmem:[#allocation5 + $0xbc0] ss:$8 sps:$4 sm:$0xff]  }
 0x195   :  { %2689 = vmatpush1.bf16.msra.mxu1 %v4170_v26  ;;  %v4266_v26 = vld [vmem:[#allocation5 + $0x5d4] ss:$8 sps:$4 sm:$0xff]  }
 0x196   :  { %2935 = vmatpush1.bf16.msra.mxu0 %v4173_v27  ;;  %2690 = vmatprep.subr.bf16.mxu1 %v4178_v29  ;;  %v4269_v27 = vld [vmem:[#allocation5 + $0xbd4] ss:$8 sps:$4 sm:$0xff]   ;;  %v4264_v29 = vld [vmem:[#allocation5 + $0x5d0] ss:$8 sps:$4 sm:$0xff]  }
 0x197   :  { %2936 = vmatprep.subr.bf16.mxu0 %v4181_v18  ;;  %v4267_v18 = vld [vmem:[#allocation5 + $0xbd0] ss:$8 sps:$4 sm:$0xff]  }
 0x199   :  { %2691 = vmatpush1.bf16.msra.mxu1 %v4176_v30  ;;  %v4272_v30 = vld [vmem:[#allocation5 + $0x5e4] ss:$8 sps:$4 sm:$0xff]  }
 0x19a   :  { %2937 = vmatpush1.bf16.msra.mxu0 %v4179_v31  ;;  %2701 = vmatprep.subr.bf16.mxu1 %v4186_v32  ;;  %v4275_v31 = vld [vmem:[#allocation5 + $0xbe4] ss:$8 sps:$4 sm:$0xff]   ;;  %v4270_v32 = vld [vmem:[#allocation5 + $0x5e0] ss:$8 sps:$4 sm:$0xff]  }
 0x19b   :  { %2947 = vmatprep.subr.bf16.mxu0 %v4191_v33  ;;  %v4273_v33 = vld [vmem:[#allocation5 + $0xbe0] ss:$8 sps:$4 sm:$0xff]  }
 0x19c   :  { %2693 = vmatmul.mubr.bf16.vlgmr.msra.gmra.mrb[0].mxu1 %v3193_v34  ;;  %v4278_v34 = vld [vmem:[#allocation5 + $0x5f4] ss:$8 sps:$4 sm:$0xff]  }
 0x19d   :  { %2939 = vmatmul.mubr.bf16.vlgmr.msra.gmra.mrb[0].mxu0 %v3205_v35  ;;  %2702 = vmatpush1.bf16.msra.mxu1 %v4184_v36  ;;  %v4281_v35 = vld [vmem:[#allocation5 + $0xbf4] ss:$8 sps:$4 sm:$0xff]   ;;  %v4276_v36 = vld [vmem:[#allocation5 + $0x5f0] ss:$8 sps:$4 sm:$0xff]  }
 0x19e   :  { %2948 = vmatpush1.bf16.msra.mxu0 %v4189_v37  ;;  %2703 = vmatprep.subr.bf16.mxu1 %v4194_v38  ;;  %v4279_v37 = vld [vmem:[#allocation5 + $0xbf0] ss:$8 sps:$4 sm:$0xff]   ;;  %v4286_v38 = vld [vmem:[#allocation8 + $0x40] sm:$0xff]  }
 0x19f   :  { %2949 = vmatprep.subr.bf16.mxu0 %v4197_v39  ;;  %2733 = vmatprep.mubr.bf16.mxu1 %v3196_v40  ;;  %v3195_v39 = vcombine.low %v4590_v24, %v4590_v24  ;;  %v3207_v40 = vcombine.low %v4592_v25, %v4592_v25  ;;  %v4293_v24 = vld [vmem:[#allocation8 + $0x18] sm:$0xff]   ;;  %v4295_v25 = vld [vmem:[#allocation8 + $0x20] sm:$0xff]  }
 0x1a0   :  { %2979 = vmatprep.mubr.bf16.mxu0 %v3208_v28  ;;  %v4287_v28 = vld [vmem:[#allocation8] sm:$0xff]  }
 0x1a1   :  { %2704 = vmatpush1.bf16.msra.mxu1 %v4192_v20  ;;  %v4288_v20 = vld [vmem:[#allocation8 + $0x48] sm:$0xff]  }
 0x1a2   :  { %2950 = vmatpush1.bf16.msra.mxu0 %v4195_v41  ;;  %2705 = vmatprep.subr.bf16.mxu1 %v4200_v42  ;;  %v4289_v41 = vld [vmem:[#allocation8 + $0x8] sm:$0xff]   ;;  %v4290_v42 = vld [vmem:[#allocation8 + $0x50] sm:$0xff]  }
 0x1a3   :  { %2951 = vmatprep.subr.bf16.mxu0 %v4203_v43  ;;  %v4291_v43 = vld [vmem:[#allocation8 + $0x10] sm:$0xff]  }
 0x1a5   :  { %2706 = vmatpush1.bf16.msra.mxu1 %v4198_v44  ;;  %v4292_v44 = vld [vmem:[#allocation8 + $0x58] sm:$0xff]  }
 0x1a6   :  { %2952 = vmatpush1.bf16.msra.mxu0 %v4201_v45  ;;  %2707 = vmatprep.subr.bf16.mxu1 %v4206_v46  ;;  %v4294_v45 = vld [vmem:[#allocation8 + $0x60] sm:$0xff]   ;;  %v4296_v46 = vld [vmem:[#allocation8 + $0x68] sm:$0xff]  }
 0x1a7   :  { %2953 = vmatprep.subr.bf16.mxu0 %v4209_v47  ;;  %v4297_v47 = vld [vmem:[#allocation8 + $0x28] sm:$0xff]  }
 0x1a9   :  { %2708 = vmatpush1.bf16.msra.mxu1 %v4204_v48  ;;  %v4298_v48 = vld [vmem:[#allocation8 + $0x70] sm:$0xff]  }
 0x1aa   :  { %2954 = vmatpush1.bf16.msra.mxu0 %v4207_v49  ;;  %2709 = vmatprep.subr.bf16.mxu1 %v4212_v50  ;;  %v4299_v49 = vld [vmem:[#allocation8 + $0x30] sm:$0xff]   ;;  %v4300_v50 = vld [vmem:[#allocation8 + $0x78] sm:$0xff]  }
 0x1ab   :  { %2955 = vmatprep.subr.bf16.mxu0 %v4215_v51  ;;  %v4301_v51 = vld [vmem:[#allocation8 + $0x38] sm:$0xff]  }
 0x1ad   :  { %2710 = vmatpush1.bf16.msra.mxu1 %v4210_v52  ;;  %v482_v52 = vlaneseq }
 0x1ae   :  { %2956 = vmatpush1.bf16.msra.mxu0 %v4213_v53  ;;  %2711 = vmatprep.subr.bf16.mxu1 %v4218_v54 }
 0x1af   :  { %2957 = vmatprep.subr.bf16.mxu0 %v4221_v55  ;;  %v483_v53 = vshrl.u32 %v482_v52, 7  ;;  %v480_v55 = vld [vmem:[#allocation7] sm:$0x3] }
 0x1b1   :  { %2712 = vmatpush1.bf16.msra.mxu1 %v4216_v56  ;;  %v484_v54 = vsub.s32 0, %v483_v53  ;;  %v488_v56 = vsub.s32 1, %v483_v53 }
 0x1b2   :  { %2958 = vmatpush1.bf16.msra.mxu0 %v4219_v57  ;;  %2713 = vmatprep.subr.bf16.mxu1 %v4224_v58 }
 0x1b3   :  { %2959 = vmatprep.subr.bf16.mxu0 %v4227_v59  ;;  %v485_v57 = vrot.slane %v480_v55, %v484_v54  ;;  %v489_v58 = vrot.slane %v480_v55, %v488_v56 }
 0x1b5   :  { %2714 = vmatpush1.bf16.msra.mxu1 %v4222_v60 }
 0x1b6   :  { %2960 = vmatpush1.bf16.msra.mxu0 %v4225_v61  ;;  %2715 = vmatprep.subr.bf16.mxu1 %v4230_v62 }
 0x1b7   :  { %2961 = vmatprep.subr.bf16.mxu0 %v4233_v63 }
 0x1b9   :  { %2716 = vmatpush1.bf16.msra.mxu1 %v4228_v0 }
 0x1ba   :  { %2962 = vmatpush1.bf16.msra.mxu0 %v4231_v1  ;;  %2717 = vmatprep.subr.bf16.mxu1 %v4236_v2 }
 0x1bb   :  { %2963 = vmatprep.subr.bf16.mxu0 %v4239_v3 }
 0x1bd   :  { %2718 = vmatpush1.bf16.msra.mxu1 %v4234_v4 }
 0x1be   :  { %2964 = vmatpush1.bf16.msra.mxu0 %v4237_v5  ;;  %2719 = vmatprep.subr.bf16.mxu1 %v4242_v6 }
 0x1bf   :  { %2965 = vmatprep.subr.bf16.mxu0 %v4245_v7 }
 0x1c1   :  { %2720 = vmatpush1.bf16.msra.mxu1 %v4240_v8 }
 0x1c2   :  { %2966 = vmatpush1.bf16.msra.mxu0 %v4243_v9  ;;  %2721 = vmatprep.subr.bf16.mxu1 %v4248_v10 }
 0x1c3   :  { %2967 = vmatprep.subr.bf16.mxu0 %v4251_v11 }
 0x1c5   :  { %2722 = vmatpush1.bf16.msra.mxu1 %v4246_v12  ;;  %v3593_v12 = vld [vmem:[#allocation10] ss:$0 sm:$0xff] }
 0x1c6   :  { %2968 = vmatpush1.bf16.msra.mxu0 %v4249_v13  ;;  %2723 = vmatprep.subr.bf16.mxu1 %v4254_v14 }
 0x1c7   :  { %2969 = vmatprep.subr.bf16.mxu0 %v4257_v15 }
 0x1c9   :  { %2724 = vmatpush1.bf16.msra.mxu1 %v4252_v16 }
 0x1ca   :  { %2970 = vmatpush1.bf16.msra.mxu0 %v4255_v17  ;;  %2725 = vmatprep.subr.bf16.mxu1 %v4260_v19 }
 0x1cb   :  { %2971 = vmatprep.subr.bf16.mxu0 %v4263_v21 }
 0x1cd   :  { %2726 = vmatpush1.bf16.msra.mxu1 %v4258_v22 }
 0x1ce   :  { %2972 = vmatpush1.bf16.msra.mxu0 %v4261_v23  ;;  %2727 = vmatprep.subr.bf16.mxu1 %v4266_v26 }
 0x1cf   :  { %2973 = vmatprep.subr.bf16.mxu0 %v4269_v27 }
 0x1d1   :  { %2728 = vmatpush1.bf16.msra.mxu1 %v4264_v29 }
 0x1d2   :  { %2974 = vmatpush1.bf16.msra.mxu0 %v4267_v18  ;;  %2729 = vmatprep.subr.bf16.mxu1 %v4272_v30 }
 0x1d3   :  { %2975 = vmatprep.subr.bf16.mxu0 %v4275_v31 }
 0x1d5   :  { %2730 = vmatpush1.bf16.msra.mxu1 %v4270_v32 }
 0x1d6   :  { %2976 = vmatpush1.bf16.msra.mxu0 %v4273_v33  ;;  %2731 = vmatprep.subr.bf16.mxu1 %v4278_v34 }
 0x1d7   :  { %2977 = vmatprep.subr.bf16.mxu0 %v4281_v35 }
 0x1d9   :  { %2732 = vmatpush1.bf16.msra.mxu1 %v4276_v36 }
 0x1da   :  { %2978 = vmatpush1.bf16.msra.mxu0 %v4279_v37  ;;  %3610 = vmatprep.subr.bf16.mxu1 %v4286_v38 }
 0x1dc   :  { %2734 = vmatmul.mubr.bf16.vlgmr.msra.gmra.mrb[0].mxu1 %v3195_v39 }
 0x1dd   :  { %2980 = vmatmul.mubr.bf16.vlgmr.msra.gmra.mrb[0].mxu0 %v3207_v40  ;;  %3611 = vmatpush3.bf16.msra.mxu1 %v4287_v28 }
 0x1de   :  { %3612 = vmatprep.subr.bf16.mxu1 %v4288_v20 }
 0x1e1   :  { %3613 = vmatpush3.bf16.msra.mxu1 %v4289_v41 }
 0x1e2   :  { %3614 = vmatprep.subr.bf16.mxu1 %v4290_v42 }
 0x1e5   :  { %3615 = vmatpush3.bf16.msra.mxu1 %v4291_v43 }
 0x1e6   :  { %3616 = vmatprep.subr.bf16.mxu1 %v4292_v44 }
 0x1e9   :  { %3617 = vmatpush3.bf16.msra.mxu1 %v4293_v24 }
 0x1ea   :  { %3618 = vmatprep.subr.bf16.mxu1 %v4294_v45 }
 0x1ed   :  { %3619 = vmatpush3.bf16.msra.mxu1 %v4295_v25 }
 0x1ee   :  { %3620 = vmatprep.subr.bf16.mxu1 %v4296_v46 }
 0x1f1   :  { %3621 = vmatpush3.bf16.msra.mxu1 %v4297_v47 }
 0x1f2   :  { %3622 = vmatprep.subr.bf16.mxu1 %v4298_v48 }
 0x1f5   :  { %3623 = vmatpush3.bf16.msra.mxu1 %v4299_v49 }
 0x1f6   :  { %3624 = vmatprep.subr.bf16.mxu1 %v4300_v50 }
 0x1f9   :  { %3625 = vmatpush3.bf16.msra.mxu1 %v4301_v51 }
 0x2af   :  { %v2735_v59 = vpop.f32.mrb[0].mxu1 }
 0x2b0   :  { %v2981_v60 = vpop.f32.mrb[0].mxu0  ;;  %v3632_v61 = vadd.f32 %v2735_v59, %v485_v57  ;;  %v2737_v62 = vpop.f32.mrb[1].mxu1 }
 0x2b1   :  { %v2983_v63 = vpop.f32.mrb[1].mxu0  ;;  %v3634_v0 = vadd.f32 %v2737_v62, %v489_v58  ;;  %v2739_v1 = vpop.f32.mrb[2].mxu1 }
 0x2b2   :  { %v2985_v2 = vpop.f32.mrb[2].mxu0  ;;  %v3633_v3 = vadd.f32 %v3632_v61, %v2981_v60  ;;  %v2740_v4 = vpop.f32.mrb[3].mxu1 }
 0x2b3   :  { %v2986_v5 = vpop.f32.mrb[3].mxu0  ;;  %v3635_v6 = vadd.f32 %v3634_v0, %v2983_v63 }
 0x2b4   :  { %v2988_v7 = vmax.f32 %v3633_v3, 0.0 }
 0x2b5   :  { %v2989_v8 = vmax.f32 %v3635_v6, 0.0 }
 0x2b6   :  { %v2990_v10 = vpack.c.bf16 %v2988_v7, %v2988_v7 }
 0x2b7   :  { %v2991_v9 = vpack.c.bf16 %v2989_v8, %v2989_v8 }
 0x2b9   :  { %3159 = vmatprep.mubr.bf16.mxu1 %v2991_v9 }
 0x2ba   :  { %3160 = vmatmul.mubr.bf16.vlgmr.msra.gmra.mrb[4].mxu1 %v2990_v10 }
 0x38d   :  { %v3626_v11 = vpop.f32.mrb[4].mxu1 }
 0x38e   :  { %v3627_v13 = vpop.f32.mrb[5].mxu1 }
 0x38f   :  { %v3628_v14 = vadd.f32 %v3627_v13, %v3626_v11  ;;  %v3629_v15 = vpop.f32.mrb[6].mxu1 }
 0x390   :  { %v3630_v16 = vpop.f32.mrb[7].mxu1 }
 0x391   :  { %v3162_v17 = vadd.f32 %v3628_v14, %v3593_v12 }
 0x393   :  { %3167 = vst [vmem:[#allocation11] sm:$0xff] %v3162_v17 }
 0x394   :  { %4423 = shalt.err (!%p4420_p2)
}
 0x395   :  { %s4424_s6 = scalar_lea.hbm %s4619_s5, 128 }
 0x396   :  { %p4425_p3 = scmp.ne.s32.totalorder %s4619_s5, %s4424_s6  ;;  %p4428_p4 = scmp.lt.u32.totalorder %s4424_s6, %s4619_s5 }
 0x398   :  { %p4430_p5 = pnand %p4428_p4, %p4425_p3 }
 0x39a   :  { %4433 = shalt.err (!%p4430_p5)
}
 0x39b   :  { %3177 = dma.vmem_to_hbm [thread:$0]  %s3175_s28, 128, %s4619_s5, [#allocation4]  }
 0x39c   :  { %4440 = dma.done.wait [#allocation4], 128  }
 0x39d   :  { %4441 = vsyncadd [#allocation4], 4294967168 }
 0x39e   :  { %3181 = vsyncpa [#allocation3], 1 }
 0x39f   :  { %3182 = vsyncpa [#allocation6], 1 }
 0x3a0   :  { %3183 = vsyncpa [#allocation9], 1 }
 0x3a1   :  { %3184 = vsyncpa [#allocation4], 1 }

</bundles_post_ra>
